<compile_context>
chip_gen: v5e
topology: v5e:2x2
jax: 0.10.0
libtpu: 0.0.40
codegen_flags: <defaults>
</compile_context>

<pallas_src>
import functools
import math

import jax
import jax.numpy as jnp
from jax.experimental import pallas as pl
from jax.experimental.pallas import tpu as pltpu

D_MODEL = 128
NHEAD = 8
D_K = D_MODEL // NHEAD
LN_EPS = 1e-5


def _layernorm(x, gamma, beta):
    mu = jnp.mean(x, axis=-1, keepdims=True)
    var = jnp.mean((x - mu) ** 2, axis=-1, keepdims=True)
    return (x - mu) * jax.lax.rsqrt(var + LN_EPS) * gamma + beta


def stage_encoder_kernel(q_ref, k_ref, v_ref, w_ref, vec_ref, out_ref, *, mm_dtype):
    """One grid step = one (TB, S, D) batch tile; whole layer fused."""
    TB, S, D = q_ref.shape
    scale = 1.0 / math.sqrt(D_K)

    q = q_ref[...]                                  # (TB, S, D) f32: residual path
    # MXU operands: cast exactly once (astype to the same dtype is a no-op);
    # elementwise math (softmax, residuals, LayerNorm) stays f32.
    q_m = q.astype(mm_dtype)
    k_m = (k_ref[...] * scale).astype(mm_dtype)     # fold 1/sqrt(d_k) into k once
    v_m = v_ref[...].astype(mm_dtype)

    # Packed params: w_ref = [Wo^T, W1^T] (pre-transposed, pre-cast host-side);
    # vec_ref rows = [b1, g1, be1, g2, be2, 0, 0, 0].
    wo_t = w_ref[0]                                 # (D, D)
    w1_t = w_ref[1]
    vecs = vec_ref[...]                             # (8, D) f32
    b1, g1, be1, g2, be2 = vecs[0:1], vecs[1:2], vecs[2:3], vecs[3:4], vecs[4:5]

    # ---- multi-head attention: per-head batched contractions ----------------
    # scores_h[b,i,j] = (q_h[b,i,:] * scale) @ k_h[b,j,:]  (TB batches, (S,16)x(16,S))
    shifted = []
    for h in range(NHEAD):
        hd = slice(h * D_K, (h + 1) * D_K)
        s_h = jnp.einsum('bid,bjd->bij', q_m[:, :, hd], k_m[:, :, hd],
                         preferred_element_type=jnp.float32)        # (TB, S, S)
        shifted.append(s_h - jnp.max(s_h, axis=-1, keepdims=True))
    # One lane-dense exp over all heads: (TB, S, NHEAD*S) = 64 lanes for S=8.
    e = jnp.exp(jnp.concatenate(shifted, axis=-1))
    e_m = e.astype(mm_dtype)

    outs, invs = [], []
    for h in range(NHEAD):
        ks = slice(h * S, (h + 1) * S)
        hd = slice(h * D_K, (h + 1) * D_K)
        den = jnp.sum(e[:, :, ks], axis=-1, keepdims=True)           # (TB, S, 1)
        invs.append(jnp.broadcast_to(pl.reciprocal(den, approx=True),
                                     (TB, S, D_K)))
        # Unnormalized out_h[b,i,:] = e_h[b,i,:] @ v_h[b,:,:]; p is never
        # broadcast to 128 lanes.
        outs.append(jnp.einsum('bij,bjd->bid', e_m[:, :, ks], v_m[:, :, hd],
                               preferred_element_type=jnp.float32))  # (TB, S, 16)
    # Deferred softmax normalization: one dense (TB, S, D) multiply.
    attn = jnp.concatenate(outs, axis=-1) * jnp.concatenate(invs, axis=-1)

    # ---- output projection + residual + LN1, flattened to (TB*S, D) rows ----
    x2 = attn.reshape(TB * S, D).astype(mm_dtype)
    proj = jnp.dot(x2, wo_t, preferred_element_type=jnp.float32)
    src = _layernorm(q.reshape(TB * S, D) + proj, g1, be1)   # dropout1 = identity

    # ---- mlp1 + ReLU + residual + LN2 ----------------------------------------
    h1 = jnp.dot(src.astype(mm_dtype), w1_t, preferred_element_type=jnp.float32) + b1
    src = _layernorm(src + jnp.maximum(h1, 0.0), g2, be2)    # dropout2/3 = identity

    out_ref[...] = src.reshape(TB, S, D).astype(out_ref.dtype)


def _choose_block_batch(B, S):
    """Pick TB: ~512 rows (TB*S) per step; >=2 steps when each step still has
    >=64 rows (v7x has 2 TCs); tb = ceil(B / n_steps) so padding < one block."""
    tb_target = max(1, min(B, max(1, 512 // S)))
    n_steps = pl.cdiv(B, tb_target)
    if n_steps < 2 and B > 1 and (pl.cdiv(B, 2) * S) >= 64:
        n_steps = 2
    return pl.cdiv(B, n_steps)


def stage_encoder_layer(query, key, value, params, *,
                        matmul_dtype=jnp.float32, block_batch=None):
    B, S, D = query.shape
    assert D == D_MODEL, f"d_model must be {D_MODEL}, got {D}"
    wo, w1, b1, g1, be1, g2, be2 = params

    # Pack params host-side (few big operands; weights pre-transposed + pre-cast).
    wstack = jnp.stack([wo.T, w1.T]).astype(matmul_dtype)                 # (2, D, D)
    vstack = jnp.concatenate(
        [b1, g1, be1, g2, be2, jnp.zeros((3, D), jnp.float32)], axis=0)    # (8, D)

    tb = (max(1, min(B, block_batch)) if block_batch is not None
          else _choose_block_batch(B, S))
    n_blocks = pl.cdiv(B, tb)
    Bp = n_blocks * tb
    if Bp != B:
        # tb = ceil(B / n_steps) keeps this padding to < tb batches of (S, D).
        # TODO(synk): mask the tail block in-kernel instead of padding in HBM.
        pad = ((0, Bp - B), (0, 0), (0, 0))
        query_p, key_p, value_p = (jnp.pad(query, pad), jnp.pad(key, pad),
                                   jnp.pad(value, pad))
    else:
        query_p, key_p, value_p = query, key, value

    bsd = pl.BlockSpec((tb, S, D), lambda b: (b, 0, 0))
    wsp = pl.BlockSpec((2, D, D), lambda b: (0, 0, 0))   # resident (constant index)
    vsp = pl.BlockSpec((8, D), lambda b: (0, 0))

    out = pl.pallas_call(
        functools.partial(stage_encoder_kernel, mm_dtype=matmul_dtype),
        out_shape=jax.ShapeDtypeStruct((Bp, S, D), query.dtype),
        grid=(n_blocks,),
        in_specs=[bsd, bsd, bsd, wsp, vsp],
        out_specs=bsd,
        compiler_params=pltpu.CompilerParams(dimension_semantics=("parallel",)),
    )(query_p, key_p, value_p, wstack, vstack)
    return out[:B] if Bp != B else out


def reference(query, key, value, params):
    """Pure-JAX replica of StageEncoderLayer.forward (eval mode)."""
    wo, w1, b1, g1, be1, g2, be2 = params
    B, S, D = query.shape
    q = query.reshape(B, S, NHEAD, D_K).transpose(0, 2, 1, 3)
    k = key.reshape(B, S, NHEAD, D_K).transpose(0, 2, 1, 3)
    v = value.reshape(B, S, NHEAD, D_K).transpose(0, 2, 1, 3)
    scores = jnp.einsum('bhqd,bhkd->bhqk', q, k) / math.sqrt(D_K)
    p = jax.nn.softmax(scores, axis=-1)
    x = jnp.einsum('bhqk,bhkd->bhqd', p, v)
    x = x.transpose(0, 2, 1, 3).reshape(B, S, D)
    out = x @ wo.T
    src = query + out
    src = _layernorm(src, g1[0], be1[0])
    src2 = jnp.maximum(src @ w1.T + b1[0], 0.0)
    src = src + src2
    src = _layernorm(src, g2[0], be2[0])
    return src


if __name__ == "__main__":
    B, S, D = 2, 8, D_MODEL
    key0 = jax.random.PRNGKey(0)
    kq, kk, kv, kwo, kw1, kb1, kg1, kg2 = jax.random.split(key0, 8)

    query = jax.random.normal(kq, (B, S, D), dtype=jnp.float32)
    keyt = jax.random.normal(kk, (B, S, D), dtype=jnp.float32)
    value = jax.random.normal(kv, (B, S, D), dtype=jnp.float32)

    # Deterministic parameter init (shapes from the PyTorch __init__).
    wo = 0.05 * jax.random.normal(kwo, (D, D), dtype=jnp.float32)       # output_linear.weight
    w1 = 0.05 * jax.random.normal(kw1, (D, D), dtype=jnp.float32)       # mlp1.weight
    b1 = 0.1 * jax.random.normal(kb1, (1, D), dtype=jnp.float32)        # mlp1.bias
    g1 = 1.0 + 0.1 * jax.random.normal(kg1, (1, D), dtype=jnp.float32)  # norm1.weight
    be1 = jnp.zeros((1, D), dtype=jnp.float32)                          # norm1.bias
    g2 = 1.0 + 0.1 * jax.random.normal(kg2, (1, D), dtype=jnp.float32)  # norm2.weight
    be2 = jnp.zeros((1, D), dtype=jnp.float32)                          # norm2.bias
    params = (wo, w1, b1, g1, be1, g2, be2)

    # 1) Small shape, f32 matmuls. Tolerance covers only the EUP approx
    #    reciprocal used for the softmax denominator; everything else is f32.
    out = jax.block_until_ready(stage_encoder_layer(query, keyt, value, params))
    ref = reference(query, keyt, value, params)
    assert out.shape == (B, S, D)
    assert jnp.allclose(out, ref, atol=5e-3, rtol=5e-3), \
        f"f32 max abs err {jnp.max(jnp.abs(out - ref))}"

    # 2) Larger batch: exercises batch folding (tb=34 -> 2 grid steps of 272
    #    rows each) and the minimal 1-batch padding path.
    B2 = 67
    kq2, kk2, kv2 = jax.random.split(jax.random.PRNGKey(1), 3)
    q2 = jax.random.normal(kq2, (B2, S, D), dtype=jnp.float32)
    k2 = jax.random.normal(kk2, (B2, S, D), dtype=jnp.float32)
    v2 = jax.random.normal(kv2, (B2, S, D), dtype=jnp.float32)
    out2 = jax.block_until_ready(stage_encoder_layer(q2, k2, v2, params))
    ref2 = reference(q2, k2, v2, params)
    assert out2.shape == (B2, S, D)
    assert jnp.allclose(out2, ref2, atol=5e-3, rtol=5e-3), \
        f"f32 batched max abs err {jnp.max(jnp.abs(out2 - ref2))}"

    # 3) bf16 MXU-operand path (v6e/v7x): bf16 operands, f32 accumulation,
    #    all elementwise math still f32; looser tolerance.
    out3 = jax.block_until_ready(
        stage_encoder_layer(q2, k2, v2, params, matmul_dtype=jnp.bfloat16))
    assert jnp.allclose(out3, ref2, atol=5e-2, rtol=5e-2), \
        f"bf16 max abs err {jnp.max(jnp.abs(out3 - ref2))}"

    print("KERNEL_OK")
</pallas_src>

<mosaic_0001>
module attributes {stable_mosaic.version = 11 : i64} {
  func.func @stage_encoder_kernel(%arg0: i32, %arg1: memref<2x8x128xf32, #tpu.memory_space<vmem>>, %arg2: memref<2x8x128xf32, #tpu.memory_space<vmem>>, %arg3: memref<2x8x128xf32, #tpu.memory_space<vmem>>, %arg4: memref<2x128x128xf32, #tpu.memory_space<vmem>>, %arg5: memref<8x128xf32, #tpu.memory_space<vmem>>, %arg6: memref<2x8x128xf32, #tpu.memory_space<vmem>>) attributes {dimension_semantics = [#tpu.dimension_semantics<parallel>], iteration_bounds = array<i64: 1>, scalar_prefetch = 0 : i64, scratch_operands = 0 : i64, tpu.core_type = #tpu.core_type<tc>, window_params = [{transform_indices = @transform_0, window_bounds = array<i64: 2, 8, 128>}, {transform_indices = @transform_1, window_bounds = array<i64: 2, 8, 128>}, {transform_indices = @transform_2, window_bounds = array<i64: 2, 8, 128>}, {pipeline_mode = #tpu.pipeline_mode<synchronous>, transform_indices = @transform_3, window_bounds = array<i64: 2, 128, 128>}, {pipeline_mode = #tpu.pipeline_mode<synchronous>, transform_indices = @transform_4, window_bounds = array<i64: 8, 128>}, {transform_indices = @transform_5, window_bounds = array<i64: 2, 8, 128>}]} {
    %c0 = arith.constant 0 : index
    %c0_0 = arith.constant 0 : index
    %c0_1 = arith.constant 0 : index
    %0 = vector.load %arg1[%c0, %c0_0, %c0_1] : memref<2x8x128xf32, #tpu.memory_space<vmem>>, vector<2x8x128xf32>
    %c0_2 = arith.constant 0 : index
    %c0_3 = arith.constant 0 : index
    %c0_4 = arith.constant 0 : index
    %1 = vector.load %arg2[%c0_2, %c0_3, %c0_4] : memref<2x8x128xf32, #tpu.memory_space<vmem>>, vector<2x8x128xf32>
    %cst = arith.constant 2.500000e-01 : f32
    %2 = vector.broadcast %cst : f32 to vector<2x8x128xf32>
    %3 = arith.mulf %1, %2 : vector<2x8x128xf32>
    %c0_5 = arith.constant 0 : index
    %c0_6 = arith.constant 0 : index
    %c0_7 = arith.constant 0 : index
    %4 = vector.load %arg3[%c0_5, %c0_6, %c0_7] : memref<2x8x128xf32, #tpu.memory_space<vmem>>, vector<2x8x128xf32>
    %c0_8 = arith.constant 0 : index
    %c0_9 = arith.constant 0 : index
    %c0_10 = arith.constant 0 : index
    %5 = vector.load %arg4[%c0_8, %c0_9, %c0_10] : memref<2x128x128xf32, #tpu.memory_space<vmem>>, vector<1x128x128xf32>
    %6 = vector.shape_cast %5 : vector<1x128x128xf32> to vector<128x128xf32>
    %c1 = arith.constant 1 : index
    %c0_11 = arith.constant 0 : index
    %c0_12 = arith.constant 0 : index
    %7 = vector.load %arg4[%c1, %c0_11, %c0_12] : memref<2x128x128xf32, #tpu.memory_space<vmem>>, vector<1x128x128xf32>
    %8 = vector.shape_cast %7 : vector<1x128x128xf32> to vector<128x128xf32>
    %c0_13 = arith.constant 0 : index
    %c0_14 = arith.constant 0 : index
    %9 = vector.load %arg5[%c0_13, %c0_14] : memref<8x128xf32, #tpu.memory_space<vmem>>, vector<8x128xf32>
    %10 = vector.extract_strided_slice %9 {offsets = [0, 0], sizes = [1, 128], strides = [1, 1]} : vector<8x128xf32> to vector<1x128xf32>
    %11 = vector.extract_strided_slice %9 {offsets = [1, 0], sizes = [1, 128], strides = [1, 1]} : vector<8x128xf32> to vector<1x128xf32>
    %12 = vector.extract_strided_slice %9 {offsets = [2, 0], sizes = [1, 128], strides = [1, 1]} : vector<8x128xf32> to vector<1x128xf32>
    %13 = vector.extract_strided_slice %9 {offsets = [3, 0], sizes = [1, 128], strides = [1, 1]} : vector<8x128xf32> to vector<1x128xf32>
    %14 = vector.extract_strided_slice %9 {offsets = [4, 0], sizes = [1, 128], strides = [1, 1]} : vector<8x128xf32> to vector<1x128xf32>
    %15 = vector.extract_strided_slice %0 {offsets = [0, 0, 0], sizes = [2, 8, 16], strides = [1, 1, 1]} : vector<2x8x128xf32> to vector<2x8x16xf32>
    %16 = vector.extract_strided_slice %3 {offsets = [0, 0, 0], sizes = [2, 8, 16], strides = [1, 1, 1]} : vector<2x8x128xf32> to vector<2x8x16xf32>
    "tpu.trace_start"() <{level = 10 : i32, message = "bid,bjd->bij"}> : () -> ()
    %cst_15 = arith.constant dense<0.000000e+00> : vector<2x8x8xf32>
    %17 = tpu.matmul %15, %16, %cst_15 {dimension_numbers = #tpu.dot_dimension_numbers<[2], [2], [1], [1], [0, 0, 0, 1, 1, 1], [0], [0]>} : vector<2x8x16xf32>, vector<2x8x16xf32>, vector<2x8x8xf32> -> vector<2x8x8xf32>
    "tpu.trace_stop"() : () -> ()
    %cst_16 = arith.constant dense<0xFF800000> : vector<2x8xf32>
    %18 = vector.multi_reduction <maximumf>, %17, %cst_16 [2] : vector<2x8x8xf32> to vector<2x8xf32>
    %19 = vector.shape_cast %18 : vector<2x8xf32> to vector<2x8x1xf32>
    %20 = vector.broadcast %19 : vector<2x8x1xf32> to vector<2x8x8xf32>
    %21 = arith.subf %17, %20 : vector<2x8x8xf32>
    %22 = vector.extract_strided_slice %0 {offsets = [0, 0, 16], sizes = [2, 8, 16], strides = [1, 1, 1]} : vector<2x8x128xf32> to vector<2x8x16xf32>
    %23 = vector.extract_strided_slice %3 {offsets = [0, 0, 16], sizes = [2, 8, 16], strides = [1, 1, 1]} : vector<2x8x128xf32> to vector<2x8x16xf32>
    "tpu.trace_start"() <{level = 10 : i32, message = "bid,bjd->bij"}> : () -> ()
    %cst_17 = arith.constant dense<0.000000e+00> : vector<2x8x8xf32>
    %24 = tpu.matmul %22, %23, %cst_17 {dimension_numbers = #tpu.dot_dimension_numbers<[2], [2], [1], [1], [0, 0, 0, 1, 1, 1], [0], [0]>} : vector<2x8x16xf32>, vector<2x8x16xf32>, vector<2x8x8xf32> -> vector<2x8x8xf32>
    "tpu.trace_stop"() : () -> ()
    %cst_18 = arith.constant dense<0xFF800000> : vector<2x8xf32>
    %25 = vector.multi_reduction <maximumf>, %24, %cst_18 [2] : vector<2x8x8xf32> to vector<2x8xf32>
    %26 = vector.shape_cast %25 : vector<2x8xf32> to vector<2x8x1xf32>
    %27 = vector.broadcast %26 : vector<2x8x1xf32> to vector<2x8x8xf32>
    %28 = arith.subf %24, %27 : vector<2x8x8xf32>
    %29 = vector.extract_strided_slice %0 {offsets = [0, 0, 32], sizes = [2, 8, 16], strides = [1, 1, 1]} : vector<2x8x128xf32> to vector<2x8x16xf32>
    %30 = vector.extract_strided_slice %3 {offsets = [0, 0, 32], sizes = [2, 8, 16], strides = [1, 1, 1]} : vector<2x8x128xf32> to vector<2x8x16xf32>
    "tpu.trace_start"() <{level = 10 : i32, message = "bid,bjd->bij"}> : () -> ()
    %cst_19 = arith.constant dense<0.000000e+00> : vector<2x8x8xf32>
    %31 = tpu.matmul %29, %30, %cst_19 {dimension_numbers = #tpu.dot_dimension_numbers<[2], [2], [1], [1], [0, 0, 0, 1, 1, 1], [0], [0]>} : vector<2x8x16xf32>, vector<2x8x16xf32>, vector<2x8x8xf32> -> vector<2x8x8xf32>
    "tpu.trace_stop"() : () -> ()
    %cst_20 = arith.constant dense<0xFF800000> : vector<2x8xf32>
    %32 = vector.multi_reduction <maximumf>, %31, %cst_20 [2] : vector<2x8x8xf32> to vector<2x8xf32>
    %33 = vector.shape_cast %32 : vector<2x8xf32> to vector<2x8x1xf32>
    %34 = vector.broadcast %33 : vector<2x8x1xf32> to vector<2x8x8xf32>
    %35 = arith.subf %31, %34 : vector<2x8x8xf32>
    %36 = vector.extract_strided_slice %0 {offsets = [0, 0, 48], sizes = [2, 8, 16], strides = [1, 1, 1]} : vector<2x8x128xf32> to vector<2x8x16xf32>
    %37 = vector.extract_strided_slice %3 {offsets = [0, 0, 48], sizes = [2, 8, 16], strides = [1, 1, 1]} : vector<2x8x128xf32> to vector<2x8x16xf32>
    "tpu.trace_start"() <{level = 10 : i32, message = "bid,bjd->bij"}> : () -> ()
    %cst_21 = arith.constant dense<0.000000e+00> : vector<2x8x8xf32>
    %38 = tpu.matmul %36, %37, %cst_21 {dimension_numbers = #tpu.dot_dimension_numbers<[2], [2], [1], [1], [0, 0, 0, 1, 1, 1], [0], [0]>} : vector<2x8x16xf32>, vector<2x8x16xf32>, vector<2x8x8xf32> -> vector<2x8x8xf32>
    "tpu.trace_stop"() : () -> ()
    %cst_22 = arith.constant dense<0xFF800000> : vector<2x8xf32>
    %39 = vector.multi_reduction <maximumf>, %38, %cst_22 [2] : vector<2x8x8xf32> to vector<2x8xf32>
    %40 = vector.shape_cast %39 : vector<2x8xf32> to vector<2x8x1xf32>
    %41 = vector.broadcast %40 : vector<2x8x1xf32> to vector<2x8x8xf32>
    %42 = arith.subf %38, %41 : vector<2x8x8xf32>
    %43 = vector.extract_strided_slice %0 {offsets = [0, 0, 64], sizes = [2, 8, 16], strides = [1, 1, 1]} : vector<2x8x128xf32> to vector<2x8x16xf32>
    %44 = vector.extract_strided_slice %3 {offsets = [0, 0, 64], sizes = [2, 8, 16], strides = [1, 1, 1]} : vector<2x8x128xf32> to vector<2x8x16xf32>
    "tpu.trace_start"() <{level = 10 : i32, message = "bid,bjd->bij"}> : () -> ()
    %cst_23 = arith.constant dense<0.000000e+00> : vector<2x8x8xf32>
    %45 = tpu.matmul %43, %44, %cst_23 {dimension_numbers = #tpu.dot_dimension_numbers<[2], [2], [1], [1], [0, 0, 0, 1, 1, 1], [0], [0]>} : vector<2x8x16xf32>, vector<2x8x16xf32>, vector<2x8x8xf32> -> vector<2x8x8xf32>
    "tpu.trace_stop"() : () -> ()
    %cst_24 = arith.constant dense<0xFF800000> : vector<2x8xf32>
    %46 = vector.multi_reduction <maximumf>, %45, %cst_24 [2] : vector<2x8x8xf32> to vector<2x8xf32>
    %47 = vector.shape_cast %46 : vector<2x8xf32> to vector<2x8x1xf32>
    %48 = vector.broadcast %47 : vector<2x8x1xf32> to vector<2x8x8xf32>
    %49 = arith.subf %45, %48 : vector<2x8x8xf32>
    %50 = vector.extract_strided_slice %0 {offsets = [0, 0, 80], sizes = [2, 8, 16], strides = [1, 1, 1]} : vector<2x8x128xf32> to vector<2x8x16xf32>
    %51 = vector.extract_strided_slice %3 {offsets = [0, 0, 80], sizes = [2, 8, 16], strides = [1, 1, 1]} : vector<2x8x128xf32> to vector<2x8x16xf32>
    "tpu.trace_start"() <{level = 10 : i32, message = "bid,bjd->bij"}> : () -> ()
    %cst_25 = arith.constant dense<0.000000e+00> : vector<2x8x8xf32>
    %52 = tpu.matmul %50, %51, %cst_25 {dimension_numbers = #tpu.dot_dimension_numbers<[2], [2], [1], [1], [0, 0, 0, 1, 1, 1], [0], [0]>} : vector<2x8x16xf32>, vector<2x8x16xf32>, vector<2x8x8xf32> -> vector<2x8x8xf32>
    "tpu.trace_stop"() : () -> ()
    %cst_26 = arith.constant dense<0xFF800000> : vector<2x8xf32>
    %53 = vector.multi_reduction <maximumf>, %52, %cst_26 [2] : vector<2x8x8xf32> to vector<2x8xf32>
    %54 = vector.shape_cast %53 : vector<2x8xf32> to vector<2x8x1xf32>
    %55 = vector.broadcast %54 : vector<2x8x1xf32> to vector<2x8x8xf32>
    %56 = arith.subf %52, %55 : vector<2x8x8xf32>
    %57 = vector.extract_strided_slice %0 {offsets = [0, 0, 96], sizes = [2, 8, 16], strides = [1, 1, 1]} : vector<2x8x128xf32> to vector<2x8x16xf32>
    %58 = vector.extract_strided_slice %3 {offsets = [0, 0, 96], sizes = [2, 8, 16], strides = [1, 1, 1]} : vector<2x8x128xf32> to vector<2x8x16xf32>
    "tpu.trace_start"() <{level = 10 : i32, message = "bid,bjd->bij"}> : () -> ()
    %cst_27 = arith.constant dense<0.000000e+00> : vector<2x8x8xf32>
    %59 = tpu.matmul %57, %58, %cst_27 {dimension_numbers = #tpu.dot_dimension_numbers<[2], [2], [1], [1], [0, 0, 0, 1, 1, 1], [0], [0]>} : vector<2x8x16xf32>, vector<2x8x16xf32>, vector<2x8x8xf32> -> vector<2x8x8xf32>
    "tpu.trace_stop"() : () -> ()
    %cst_28 = arith.constant dense<0xFF800000> : vector<2x8xf32>
    %60 = vector.multi_reduction <maximumf>, %59, %cst_28 [2] : vector<2x8x8xf32> to vector<2x8xf32>
    %61 = vector.shape_cast %60 : vector<2x8xf32> to vector<2x8x1xf32>
    %62 = vector.broadcast %61 : vector<2x8x1xf32> to vector<2x8x8xf32>
    %63 = arith.subf %59, %62 : vector<2x8x8xf32>
    %64 = vector.extract_strided_slice %0 {offsets = [0, 0, 112], sizes = [2, 8, 16], strides = [1, 1, 1]} : vector<2x8x128xf32> to vector<2x8x16xf32>
    %65 = vector.extract_strided_slice %3 {offsets = [0, 0, 112], sizes = [2, 8, 16], strides = [1, 1, 1]} : vector<2x8x128xf32> to vector<2x8x16xf32>
    "tpu.trace_start"() <{level = 10 : i32, message = "bid,bjd->bij"}> : () -> ()
    %cst_29 = arith.constant dense<0.000000e+00> : vector<2x8x8xf32>
    %66 = tpu.matmul %64, %65, %cst_29 {dimension_numbers = #tpu.dot_dimension_numbers<[2], [2], [1], [1], [0, 0, 0, 1, 1, 1], [0], [0]>} : vector<2x8x16xf32>, vector<2x8x16xf32>, vector<2x8x8xf32> -> vector<2x8x8xf32>
    "tpu.trace_stop"() : () -> ()
    %cst_30 = arith.constant dense<0xFF800000> : vector<2x8xf32>
    %67 = vector.multi_reduction <maximumf>, %66, %cst_30 [2] : vector<2x8x8xf32> to vector<2x8xf32>
    %68 = vector.shape_cast %67 : vector<2x8xf32> to vector<2x8x1xf32>
    %69 = vector.broadcast %68 : vector<2x8x1xf32> to vector<2x8x8xf32>
    %70 = arith.subf %66, %69 : vector<2x8x8xf32>
    %71 = tpu.concatenate %21, %28, %35, %42, %49, %56, %63, %70 in 2 : vector<2x8x8xf32>, vector<2x8x8xf32>, vector<2x8x8xf32>, vector<2x8x8xf32>, vector<2x8x8xf32>, vector<2x8x8xf32>, vector<2x8x8xf32>, vector<2x8x8xf32> -> vector<2x8x64xf32>
    %72 = math.exp %71 : vector<2x8x64xf32>
    %73 = vector.extract_strided_slice %72 {offsets = [0, 0, 0], sizes = [2, 8, 8], strides = [1, 1, 1]} : vector<2x8x64xf32> to vector<2x8x8xf32>
    %cst_31 = arith.constant dense<0.000000e+00> : vector<2x8xf32>
    %74 = vector.multi_reduction <add>, %73, %cst_31 [2] : vector<2x8x8xf32> to vector<2x8xf32>
    %75 = vector.shape_cast %74 : vector<2x8xf32> to vector<2x8x1xf32>
    %76 = tpu.reciprocal %75 {approx = true} : vector<2x8x1xf32> -> vector<2x8x1xf32>
    %77 = vector.shape_cast %76 : vector<2x8x1xf32> to vector<2x8x1xf32>
    %78 = vector.broadcast %77 : vector<2x8x1xf32> to vector<2x8x16xf32>
    %79 = vector.extract_strided_slice %72 {offsets = [0, 0, 0], sizes = [2, 8, 8], strides = [1, 1, 1]} : vector<2x8x64xf32> to vector<2x8x8xf32>
    %80 = vector.extract_strided_slice %4 {offsets = [0, 0, 0], sizes = [2, 8, 16], strides = [1, 1, 1]} : vector<2x8x128xf32> to vector<2x8x16xf32>
    "tpu.trace_start"() <{level = 10 : i32, message = "bij,bjd->bid"}> : () -> ()
    %cst_32 = arith.constant dense<0.000000e+00> : vector<2x8x16xf32>
    %81 = tpu.matmul %79, %80, %cst_32 {dimension_numbers = #tpu.dot_dimension_numbers<[2], [1], [1], [2], [0, 0, 0, 1, 1, 2], [0], [0]>} : vector<2x8x8xf32>, vector<2x8x16xf32>, vector<2x8x16xf32> -> vector<2x8x16xf32>
    "tpu.trace_stop"() : () -> ()
    %82 = vector.extract_strided_slice %72 {offsets = [0, 0, 8], sizes = [2, 8, 8], strides = [1, 1, 1]} : vector<2x8x64xf32> to vector<2x8x8xf32>
    %cst_33 = arith.constant dense<0.000000e+00> : vector<2x8xf32>
    %83 = vector.multi_reduction <add>, %82, %cst_33 [2] : vector<2x8x8xf32> to vector<2x8xf32>
    %84 = vector.shape_cast %83 : vector<2x8xf32> to vector<2x8x1xf32>
    %85 = tpu.reciprocal %84 {approx = true} : vector<2x8x1xf32> -> vector<2x8x1xf32>
    %86 = vector.shape_cast %85 : vector<2x8x1xf32> to vector<2x8x1xf32>
    %87 = vector.broadcast %86 : vector<2x8x1xf32> to vector<2x8x16xf32>
    %88 = vector.extract_strided_slice %72 {offsets = [0, 0, 8], sizes = [2, 8, 8], strides = [1, 1, 1]} : vector<2x8x64xf32> to vector<2x8x8xf32>
    %89 = vector.extract_strided_slice %4 {offsets = [0, 0, 16], sizes = [2, 8, 16], strides = [1, 1, 1]} : vector<2x8x128xf32> to vector<2x8x16xf32>
    "tpu.trace_start"() <{level = 10 : i32, message = "bij,bjd->bid"}> : () -> ()
    %cst_34 = arith.constant dense<0.000000e+00> : vector<2x8x16xf32>
    %90 = tpu.matmul %88, %89, %cst_34 {dimension_numbers = #tpu.dot_dimension_numbers<[2], [1], [1], [2], [0, 0, 0, 1, 1, 2], [0], [0]>} : vector<2x8x8xf32>, vector<2x8x16xf32>, vector<2x8x16xf32> -> vector<2x8x16xf32>
    "tpu.trace_stop"() : () -> ()
    %91 = vector.extract_strided_slice %72 {offsets = [0, 0, 16], sizes = [2, 8, 8], strides = [1, 1, 1]} : vector<2x8x64xf32> to vector<2x8x8xf32>
    %cst_35 = arith.constant dense<0.000000e+00> : vector<2x8xf32>
    %92 = vector.multi_reduction <add>, %91, %cst_35 [2] : vector<2x8x8xf32> to vector<2x8xf32>
    %93 = vector.shape_cast %92 : vector<2x8xf32> to vector<2x8x1xf32>
    %94 = tpu.reciprocal %93 {approx = true} : vector<2x8x1xf32> -> vector<2x8x1xf32>
    %95 = vector.shape_cast %94 : vector<2x8x1xf32> to vector<2x8x1xf32>
    %96 = vector.broadcast %95 : vector<2x8x1xf32> to vector<2x8x16xf32>
    %97 = vector.extract_strided_slice %72 {offsets = [0, 0, 16], sizes = [2, 8, 8], strides = [1, 1, 1]} : vector<2x8x64xf32> to vector<2x8x8xf32>
    %98 = vector.extract_strided_slice %4 {offsets = [0, 0, 32], sizes = [2, 8, 16], strides = [1, 1, 1]} : vector<2x8x128xf32> to vector<2x8x16xf32>
    "tpu.trace_start"() <{level = 10 : i32, message = "bij,bjd->bid"}> : () -> ()
    %cst_36 = arith.constant dense<0.000000e+00> : vector<2x8x16xf32>
    %99 = tpu.matmul %97, %98, %cst_36 {dimension_numbers = #tpu.dot_dimension_numbers<[2], [1], [1], [2], [0, 0, 0, 1, 1, 2], [0], [0]>} : vector<2x8x8xf32>, vector<2x8x16xf32>, vector<2x8x16xf32> -> vector<2x8x16xf32>
    "tpu.trace_stop"() : () -> ()
    %100 = vector.extract_strided_slice %72 {offsets = [0, 0, 24], sizes = [2, 8, 8], strides = [1, 1, 1]} : vector<2x8x64xf32> to vector<2x8x8xf32>
    %cst_37 = arith.constant dense<0.000000e+00> : vector<2x8xf32>
    %101 = vector.multi_reduction <add>, %100, %cst_37 [2] : vector<2x8x8xf32> to vector<2x8xf32>
    %102 = vector.shape_cast %101 : vector<2x8xf32> to vector<2x8x1xf32>
    %103 = tpu.reciprocal %102 {approx = true} : vector<2x8x1xf32> -> vector<2x8x1xf32>
    %104 = vector.shape_cast %103 : vector<2x8x1xf32> to vector<2x8x1xf32>
    %105 = vector.broadcast %104 : vector<2x8x1xf32> to vector<2x8x16xf32>
    %106 = vector.extract_strided_slice %72 {offsets = [0, 0, 24], sizes = [2, 8, 8], strides = [1, 1, 1]} : vector<2x8x64xf32> to vector<2x8x8xf32>
    %107 = vector.extract_strided_slice %4 {offsets = [0, 0, 48], sizes = [2, 8, 16], strides = [1, 1, 1]} : vector<2x8x128xf32> to vector<2x8x16xf32>
    "tpu.trace_start"() <{level = 10 : i32, message = "bij,bjd->bid"}> : () -> ()
    %cst_38 = arith.constant dense<0.000000e+00> : vector<2x8x16xf32>
    %108 = tpu.matmul %106, %107, %cst_38 {dimension_numbers = #tpu.dot_dimension_numbers<[2], [1], [1], [2], [0, 0, 0, 1, 1, 2], [0], [0]>} : vector<2x8x8xf32>, vector<2x8x16xf32>, vector<2x8x16xf32> -> vector<2x8x16xf32>
    "tpu.trace_stop"() : () -> ()
    %109 = vector.extract_strided_slice %72 {offsets = [0, 0, 32], sizes = [2, 8, 8], strides = [1, 1, 1]} : vector<2x8x64xf32> to vector<2x8x8xf32>
    %cst_39 = arith.constant dense<0.000000e+00> : vector<2x8xf32>
    %110 = vector.multi_reduction <add>, %109, %cst_39 [2] : vector<2x8x8xf32> to vector<2x8xf32>
    %111 = vector.shape_cast %110 : vector<2x8xf32> to vector<2x8x1xf32>
    %112 = tpu.reciprocal %111 {approx = true} : vector<2x8x1xf32> -> vector<2x8x1xf32>
    %113 = vector.shape_cast %112 : vector<2x8x1xf32> to vector<2x8x1xf32>
    %114 = vector.broadcast %113 : vector<2x8x1xf32> to vector<2x8x16xf32>
    %115 = vector.extract_strided_slice %72 {offsets = [0, 0, 32], sizes = [2, 8, 8], strides = [1, 1, 1]} : vector<2x8x64xf32> to vector<2x8x8xf32>
    %116 = vector.extract_strided_slice %4 {offsets = [0, 0, 64], sizes = [2, 8, 16], strides = [1, 1, 1]} : vector<2x8x128xf32> to vector<2x8x16xf32>
    "tpu.trace_start"() <{level = 10 : i32, message = "bij,bjd->bid"}> : () -> ()
    %cst_40 = arith.constant dense<0.000000e+00> : vector<2x8x16xf32>
    %117 = tpu.matmul %115, %116, %cst_40 {dimension_numbers = #tpu.dot_dimension_numbers<[2], [1], [1], [2], [0, 0, 0, 1, 1, 2], [0], [0]>} : vector<2x8x8xf32>, vector<2x8x16xf32>, vector<2x8x16xf32> -> vector<2x8x16xf32>
    "tpu.trace_stop"() : () -> ()
    %118 = vector.extract_strided_slice %72 {offsets = [0, 0, 40], sizes = [2, 8, 8], strides = [1, 1, 1]} : vector<2x8x64xf32> to vector<2x8x8xf32>
    %cst_41 = arith.constant dense<0.000000e+00> : vector<2x8xf32>
    %119 = vector.multi_reduction <add>, %118, %cst_41 [2] : vector<2x8x8xf32> to vector<2x8xf32>
    %120 = vector.shape_cast %119 : vector<2x8xf32> to vector<2x8x1xf32>
    %121 = tpu.reciprocal %120 {approx = true} : vector<2x8x1xf32> -> vector<2x8x1xf32>
    %122 = vector.shape_cast %121 : vector<2x8x1xf32> to vector<2x8x1xf32>
    %123 = vector.broadcast %122 : vector<2x8x1xf32> to vector<2x8x16xf32>
    %124 = vector.extract_strided_slice %72 {offsets = [0, 0, 40], sizes = [2, 8, 8], strides = [1, 1, 1]} : vector<2x8x64xf32> to vector<2x8x8xf32>
    %125 = vector.extract_strided_slice %4 {offsets = [0, 0, 80], sizes = [2, 8, 16], strides = [1, 1, 1]} : vector<2x8x128xf32> to vector<2x8x16xf32>
    "tpu.trace_start"() <{level = 10 : i32, message = "bij,bjd->bid"}> : () -> ()
    %cst_42 = arith.constant dense<0.000000e+00> : vector<2x8x16xf32>
    %126 = tpu.matmul %124, %125, %cst_42 {dimension_numbers = #tpu.dot_dimension_numbers<[2], [1], [1], [2], [0, 0, 0, 1, 1, 2], [0], [0]>} : vector<2x8x8xf32>, vector<2x8x16xf32>, vector<2x8x16xf32> -> vector<2x8x16xf32>
    "tpu.trace_stop"() : () -> ()
    %127 = vector.extract_strided_slice %72 {offsets = [0, 0, 48], sizes = [2, 8, 8], strides = [1, 1, 1]} : vector<2x8x64xf32> to vector<2x8x8xf32>
    %cst_43 = arith.constant dense<0.000000e+00> : vector<2x8xf32>
    %128 = vector.multi_reduction <add>, %127, %cst_43 [2] : vector<2x8x8xf32> to vector<2x8xf32>
    %129 = vector.shape_cast %128 : vector<2x8xf32> to vector<2x8x1xf32>
    %130 = tpu.reciprocal %129 {approx = true} : vector<2x8x1xf32> -> vector<2x8x1xf32>
    %131 = vector.shape_cast %130 : vector<2x8x1xf32> to vector<2x8x1xf32>
    %132 = vector.broadcast %131 : vector<2x8x1xf32> to vector<2x8x16xf32>
    %133 = vector.extract_strided_slice %72 {offsets = [0, 0, 48], sizes = [2, 8, 8], strides = [1, 1, 1]} : vector<2x8x64xf32> to vector<2x8x8xf32>
    %134 = vector.extract_strided_slice %4 {offsets = [0, 0, 96], sizes = [2, 8, 16], strides = [1, 1, 1]} : vector<2x8x128xf32> to vector<2x8x16xf32>
    "tpu.trace_start"() <{level = 10 : i32, message = "bij,bjd->bid"}> : () -> ()
    %cst_44 = arith.constant dense<0.000000e+00> : vector<2x8x16xf32>
    %135 = tpu.matmul %133, %134, %cst_44 {dimension_numbers = #tpu.dot_dimension_numbers<[2], [1], [1], [2], [0, 0, 0, 1, 1, 2], [0], [0]>} : vector<2x8x8xf32>, vector<2x8x16xf32>, vector<2x8x16xf32> -> vector<2x8x16xf32>
    "tpu.trace_stop"() : () -> ()
    %136 = vector.extract_strided_slice %72 {offsets = [0, 0, 56], sizes = [2, 8, 8], strides = [1, 1, 1]} : vector<2x8x64xf32> to vector<2x8x8xf32>
    %cst_45 = arith.constant dense<0.000000e+00> : vector<2x8xf32>
    %137 = vector.multi_reduction <add>, %136, %cst_45 [2] : vector<2x8x8xf32> to vector<2x8xf32>
    %138 = vector.shape_cast %137 : vector<2x8xf32> to vector<2x8x1xf32>
    %139 = tpu.reciprocal %138 {approx = true} : vector<2x8x1xf32> -> vector<2x8x1xf32>
    %140 = vector.shape_cast %139 : vector<2x8x1xf32> to vector<2x8x1xf32>
    %141 = vector.broadcast %140 : vector<2x8x1xf32> to vector<2x8x16xf32>
    %142 = vector.extract_strided_slice %72 {offsets = [0, 0, 56], sizes = [2, 8, 8], strides = [1, 1, 1]} : vector<2x8x64xf32> to vector<2x8x8xf32>
    %143 = vector.extract_strided_slice %4 {offsets = [0, 0, 112], sizes = [2, 8, 16], strides = [1, 1, 1]} : vector<2x8x128xf32> to vector<2x8x16xf32>
    "tpu.trace_start"() <{level = 10 : i32, message = "bij,bjd->bid"}> : () -> ()
    %cst_46 = arith.constant dense<0.000000e+00> : vector<2x8x16xf32>
    %144 = tpu.matmul %142, %143, %cst_46 {dimension_numbers = #tpu.dot_dimension_numbers<[2], [1], [1], [2], [0, 0, 0, 1, 1, 2], [0], [0]>} : vector<2x8x8xf32>, vector<2x8x16xf32>, vector<2x8x16xf32> -> vector<2x8x16xf32>
    "tpu.trace_stop"() : () -> ()
    %145 = tpu.concatenate %81, %90, %99, %108, %117, %126, %135, %144 in 2 : vector<2x8x16xf32>, vector<2x8x16xf32>, vector<2x8x16xf32>, vector<2x8x16xf32>, vector<2x8x16xf32>, vector<2x8x16xf32>, vector<2x8x16xf32>, vector<2x8x16xf32> -> vector<2x8x128xf32>
    %146 = tpu.concatenate %78, %87, %96, %105, %114, %123, %132, %141 in 2 : vector<2x8x16xf32>, vector<2x8x16xf32>, vector<2x8x16xf32>, vector<2x8x16xf32>, vector<2x8x16xf32>, vector<2x8x16xf32>, vector<2x8x16xf32>, vector<2x8x16xf32> -> vector<2x8x128xf32>
    %147 = arith.mulf %145, %146 : vector<2x8x128xf32>
    %148 = vector.shape_cast %147 : vector<2x8x128xf32> to vector<16x128xf32>
    %cst_47 = arith.constant dense<0.000000e+00> : vector<16x128xf32>
    %149 = tpu.matmul %148, %6, %cst_47 {dimension_numbers = #tpu.dot_dimension_numbers<[1], [0], [0], [1], [0, 0, 1, 1], [], []>} : vector<16x128xf32>, vector<128x128xf32>, vector<16x128xf32> -> vector<16x128xf32>
    %150 = vector.shape_cast %0 : vector<2x8x128xf32> to vector<16x128xf32>
    %151 = arith.addf %150, %149 : vector<16x128xf32>
    %cst_48 = arith.constant dense<0.000000e+00> : vector<16xf32>
    %152 = vector.multi_reduction <add>, %151, %cst_48 [1] : vector<16x128xf32> to vector<16xf32>
    %153 = vector.shape_cast %152 : vector<16xf32> to vector<16x1xf32>
    %cst_49 = arith.constant 1.280000e+02 : f32
    %154 = vector.broadcast %cst_49 : f32 to vector<16x1xf32>
    %155 = arith.divf %153, %154 : vector<16x1xf32>
    %156 = vector.broadcast %155 : vector<16x1xf32> to vector<16x128xf32>
    %157 = arith.subf %151, %156 : vector<16x128xf32>
    %158 = arith.mulf %157, %157 : vector<16x128xf32>
    %cst_50 = arith.constant dense<0.000000e+00> : vector<16xf32>
    %159 = vector.multi_reduction <add>, %158, %cst_50 [1] : vector<16x128xf32> to vector<16xf32>
    %160 = vector.shape_cast %159 : vector<16xf32> to vector<16x1xf32>
    %cst_51 = arith.constant 1.280000e+02 : f32
    %161 = vector.broadcast %cst_51 : f32 to vector<16x1xf32>
    %162 = arith.divf %160, %161 : vector<16x1xf32>
    %163 = vector.broadcast %155 : vector<16x1xf32> to vector<16x128xf32>
    %164 = arith.subf %151, %163 : vector<16x128xf32>
    %cst_52 = arith.constant 9.99999974E-6 : f32
    %165 = vector.broadcast %cst_52 : f32 to vector<16x1xf32>
    %166 = arith.addf %162, %165 : vector<16x1xf32>
    %167 = math.rsqrt %166 : vector<16x1xf32>
    %168 = vector.broadcast %167 : vector<16x1xf32> to vector<16x128xf32>
    %169 = arith.mulf %164, %168 : vector<16x128xf32>
    %170 = vector.broadcast %11 : vector<1x128xf32> to vector<16x128xf32>
    %171 = arith.mulf %169, %170 : vector<16x128xf32>
    %172 = vector.broadcast %12 : vector<1x128xf32> to vector<16x128xf32>
    %173 = arith.addf %171, %172 : vector<16x128xf32>
    %cst_53 = arith.constant dense<0.000000e+00> : vector<16x128xf32>
    %174 = tpu.matmul %173, %8, %cst_53 {dimension_numbers = #tpu.dot_dimension_numbers<[1], [0], [0], [1], [0, 0, 1, 1], [], []>} : vector<16x128xf32>, vector<128x128xf32>, vector<16x128xf32> -> vector<16x128xf32>
    %175 = vector.broadcast %10 : vector<1x128xf32> to vector<16x128xf32>
    %176 = arith.addf %174, %175 : vector<16x128xf32>
    %cst_54 = arith.constant 0.000000e+00 : f32
    %177 = vector.broadcast %cst_54 : f32 to vector<16x128xf32>
    %178 = arith.maximumf %176, %177 : vector<16x128xf32>
    %179 = arith.addf %173, %178 : vector<16x128xf32>
    %cst_55 = arith.constant dense<0.000000e+00> : vector<16xf32>
    %180 = vector.multi_reduction <add>, %179, %cst_55 [1] : vector<16x128xf32> to vector<16xf32>
    %181 = vector.shape_cast %180 : vector<16xf32> to vector<16x1xf32>
    %cst_56 = arith.constant 1.280000e+02 : f32
    %182 = vector.broadcast %cst_56 : f32 to vector<16x1xf32>
    %183 = arith.divf %181, %182 : vector<16x1xf32>
    %184 = vector.broadcast %183 : vector<16x1xf32> to vector<16x128xf32>
    %185 = arith.subf %179, %184 : vector<16x128xf32>
    %186 = arith.mulf %185, %185 : vector<16x128xf32>
    %cst_57 = arith.constant dense<0.000000e+00> : vector<16xf32>
    %187 = vector.multi_reduction <add>, %186, %cst_57 [1] : vector<16x128xf32> to vector<16xf32>
    %188 = vector.shape_cast %187 : vector<16xf32> to vector<16x1xf32>
    %cst_58 = arith.constant 1.280000e+02 : f32
    %189 = vector.broadcast %cst_58 : f32 to vector<16x1xf32>
    %190 = arith.divf %188, %189 : vector<16x1xf32>
    %191 = vector.broadcast %183 : vector<16x1xf32> to vector<16x128xf32>
    %192 = arith.subf %179, %191 : vector<16x128xf32>
    %cst_59 = arith.constant 9.99999974E-6 : f32
    %193 = vector.broadcast %cst_59 : f32 to vector<16x1xf32>
    %194 = arith.addf %190, %193 : vector<16x1xf32>
    %195 = math.rsqrt %194 : vector<16x1xf32>
    %196 = vector.broadcast %195 : vector<16x1xf32> to vector<16x128xf32>
    %197 = arith.mulf %192, %196 : vector<16x128xf32>
    %198 = vector.broadcast %13 : vector<1x128xf32> to vector<16x128xf32>
    %199 = arith.mulf %197, %198 : vector<16x128xf32>
    %200 = vector.broadcast %14 : vector<1x128xf32> to vector<16x128xf32>
    %201 = arith.addf %199, %200 : vector<16x128xf32>
    %202 = vector.shape_cast %201 : vector<16x128xf32> to vector<2x8x128xf32>
    %c0_60 = arith.constant 0 : index
    %c0_61 = arith.constant 0 : index
    %c0_62 = arith.constant 0 : index
    %203 = vector.load %arg6[%c0_60, %c0_61, %c0_62] : memref<2x8x128xf32, #tpu.memory_space<vmem>>, vector<2x8x128xf32>
    tpu.vector_store %arg6[%c0_60, %c0_61, %c0_62], %202 {strides = array<i32>} : memref<2x8x128xf32, #tpu.memory_space<vmem>>, vector<2x8x128xf32>,
    return
  }
  func.func @transform_0(%arg0: i32) -> (i32, i32, i32) {
    %c0_i32 = arith.constant 0 : i32
    %c0_i32_0 = arith.constant 0 : i32
    %c0_i32_1 = arith.constant 0 : i32
    return %arg0, %c0_i32, %c0_i32_0 : i32, i32, i32
  }
  func.func @transform_1(%arg0: i32) -> (i32, i32, i32) {
    %c0_i32 = arith.constant 0 : i32
    %c0_i32_0 = arith.constant 0 : i32
    %c0_i32_1 = arith.constant 0 : i32
    return %arg0, %c0_i32, %c0_i32_0 : i32, i32, i32
  }
  func.func @transform_2(%arg0: i32) -> (i32, i32, i32) {
    %c0_i32 = arith.constant 0 : i32
    %c0_i32_0 = arith.constant 0 : i32
    %c0_i32_1 = arith.constant 0 : i32
    return %arg0, %c0_i32, %c0_i32_0 : i32, i32, i32
  }
  func.func @transform_3(%arg0: i32) -> (i32, i32, i32) {
    %c0_i32 = arith.constant 0 : i32
    %c0_i32_0 = arith.constant 0 : i32
    %c0_i32_1 = arith.constant 0 : i32
    %c0_i32_2 = arith.constant 0 : i32
    return %c0_i32, %c0_i32_0, %c0_i32_1 : i32, i32, i32
  }
  func.func @transform_4(%arg0: i32) -> (i32, i32) {
    %c0_i32 = arith.constant 0 : i32
    %c0_i32_0 = arith.constant 0 : i32
    %c0_i32_1 = arith.constant 0 : i32
    return %c0_i32, %c0_i32_0 : i32, i32
  }
  func.func @transform_5(%arg0: i32) -> (i32, i32, i32) {
    %c0_i32 = arith.constant 0 : i32
    %c0_i32_0 = arith.constant 0 : i32
    %c0_i32_1 = arith.constant 0 : i32
    return %arg0, %c0_i32, %c0_i32_0 : i32, i32, i32
  }
}

</mosaic_0001>

<bundles_post_ra>
// kernel: tpu_custom_call.1
= control target key start
LH: loop header
LB: loop body
LE: loop exit
PB: predicated region body
PF: predicated region fallthrough
CT: control target
= control target key end

     0   :  { %10 = vsyncpa [#allocation3], 0  ;;  %s2132_s0 = inlined_call_operand.hbm [shape: f32[2,8,128], index: 0, kind: input, shape index: {}]   ;;  %s2133_s1 = inlined_call_operand.hbm [shape: f32[2,8,128], index: 1, kind: input, shape index: {}]   ;;  %s2134_s2 = inlined_call_operand.hbm [shape: f32[2,8,128], index: 2, kind: input, shape index: {}]   ;;  %s2135_s3 = inlined_call_operand.hbm [shape: f32[2,128,128], index: 3, kind: input, shape index: {}]   ;;  %s2136_s4 = inlined_call_operand.hbm [shape: f32[8,128], index: 4, kind: input, shape index: {}]   ;;  %s2137_s5 = inlined_call_operand.hbm [shape: f32[2,8,128], index: 5, kind: output, shape index: {}]  }
   0x1   :  { %11 = vsyncpa [#allocation6], 0 }
   0x2   :  { %12 = vsyncpa [#allocation9], 0 }
   0x3   :  { %13 = vsyncpa [#allocation4], 0  ;;  %s31_s20 = sshll.u32 %s2133_s1, 4  ;;  %s1803_s21 = smov [#allocation5]   ;;  %s32_s20 = int_to_ptr.hbm [resolvable:$true] %s31_s20 }
   0x4   :  { %s33_s22 = sshll.u32 %s1803_s21, 4  ;;  %s57_s25 = sshll.u32 %s2135_s3, 4  ;;  %s34_s22 = int_to_ptr.vmem [resolvable:$true] %s33_s22  ;;  %s58_s25 = int_to_ptr.hbm [resolvable:$true] %s57_s25 }
   0x5   :  { %s1804_s26 = smov 128   ;;  %s1805_s27 = smov 8  }
   0x6   :  { %39 = dma.hbm_to_vmem [thread:$0]  %s32_s20, 256, %s34_s22, [#allocation6], %s1804_s26, %s1804_s26, %s1805_s27  }
   0x7   :  { %s1806_s28 = smov [#allocation8]   ;;  %s18_s1 = sshll.u32 %s2132_s0, 4  ;;  %s19_s1 = int_to_ptr.hbm [resolvable:$true] %s18_s1 }
   0x8   :  { %s59_s29 = sshll.u32 %s1806_s28, 4  ;;  %s44_s8 = sshll.u32 %s2134_s2, 4  ;;  %s60_s29 = int_to_ptr.vmem [resolvable:$true] %s59_s29  ;;  %s45_s8 = int_to_ptr.hbm [resolvable:$true] %s44_s8 }
   0x9   :  { %65 = dma.hbm_to_vmem [thread:$0]  %s58_s25, 4096, %s60_s29, [#allocation9], %s1804_s26, %s1804_s26, %s1805_s27  }
   0xa   :  { %s1807_s9 = smov [#allocation2]   ;;  %s1808_s11 = smov [#allocation7]  }
   0xb   :  { %s20_s10 = sshll.u32 %s1807_s9, 4  ;;  %s46_s0 = sshll.u32 %s1808_s11, 4  ;;  %s21_s10 = int_to_ptr.vmem [resolvable:$true] %s20_s10  ;;  %s47_s0 = int_to_ptr.vmem [resolvable:$true] %s46_s0 }
   0xc   :  { %26 = dma.hbm_to_vmem [thread:$0]  %s19_s1, 256, %s21_s10, [#allocation3], %s1804_s26, %s1804_s26, %s1805_s27  }
   0xd   :  { %s71_s14 = sshll.u32 %s2136_s4, 4  ;;  %s1809_s2 = smov [#allocation10]   ;;  %s72_s14 = int_to_ptr.hbm [resolvable:$true] %s71_s14 }
   0xe   :  { %52 = dma.hbm_to_vmem [thread:$0]  %s45_s8, 256, %s47_s0, [#allocation6], %s1804_s26, %s1804_s26, %s1805_s27  }
   0xf   :  { %s73_s15 = sshll.u32 %s1809_s2, 4  ;;  %s74_s15 = int_to_ptr.vmem [resolvable:$true] %s73_s15 }
  0x10   :  { %76 = dma.hbm_to_vmem [thread:$0]  %s72_s14, 128, %s74_s15, [#allocation9]  }
  0x11   :  { %1795 = dma.done.wait [#allocation3], 256  }
  0x12   :  { %1796 = vsyncadd [#allocation3], 4294967040 }
  0x13   :  { %1797 = dma.done.wait [#allocation6], 512  }
  0x14   :  { %1798 = vsyncadd [#allocation6], 4294966784 }
  0x15   :  { %1799 = dma.done.wait [#allocation9], 4224  }
  0x16   :  { %1800 = vsyncadd [#allocation9], 4294963072  ;;  %v97_v0 = vld [vmem:[#allocation2] sm:$0xff]  ;;  %v100_v1 = vld [vmem:[#allocation5 + $0x8] sm:$0xff]  ;;  %s1810_s4 = smov 112   ;;  %vm139_vm0 = vcmask 130048  }
  0x17   :  { %v99_v2 = vld [vmem:[#allocation5] sm:$0xff]  ;;  %201 = vrot.lane.b32.xlu0 %v97_v0, %s1810_s4  ;;  %v102_v3 = vmul.f32 0.25, %v100_v1  ;;  %v98_v4 = vld [vmem:[#allocation2 + $0x8] sm:$0xff]  ;;  %s1811_s16 = smov 96   ;;  %s1812_s17 = smov 80   ;;  %vm192_vm1 = vcmask 64512  }
  0x18   :  { %v101_v5 = vmul.f32 0.25, %v99_v2  ;;  %229 = vrot.lane.b32.xlu2 %v98_v4, %s1810_s4  ;;  %s1813_s18 = smov 48   ;;  %s1814_s19 = smov 64   ;;  %vm709_vm2 = vcmask 195584   ;;  %vm712_vm3 = vcmask 261120   ;;  %vm715_vm4 = vcmask 326656  }
  0x19   :  { %231 = vrot.lane.b32.xlu1 %v102_v3, %s1810_s4  ;;  %1499 = vmatpush.xpose.msk.msra.mxu3 %vm139_vm0, %v102_v3  ;;  %s1815_s20 = smov 16   ;;  %s1816_s21 = smov 32   ;;  %vm718_vm5 = vcmask 392192   ;;  %vm721_vm6 = vcmask 457728   ;;  %vm1294_vm7 = vcmask 523264   ;;  %vm1297_vm8 = vcmask 654336  }
  0x1a   :  { %1497 = vmatpush.xpose.msk.msra.mxu2 %vm139_vm0, %v101_v5  ;;  %s1817_s22 = smov 40   ;;  %s1818_s23 = smov 24   ;;  %vm1300_vm9 = vcmask 785408   ;;  %vm1303_vm10 = vcmask 916480  }
  0x1b   :  { %s1819_s24 = smov 56   ;;  %s1820_s25 = smov 104  }
  0x1c   :  { %1500 = vmatmul.msk.f32.vlgmr.msra.gmra.mxu3 %vm139_vm0, %v98_v4  ;;  %s1821_s28 = smov 120   ;;  %s1822_s29 = smov 88  }
  0x1d   :  { %1498 = vmatmul.msk.f32.vlgmr.msra.gmra.mxu2 %vm139_vm0, %v97_v0  ;;  %s1823_s30 = smov 72   ;;  %s1825_s6 = smov [#allocation11]  }
  0x1e   :  { %s1480_s1 = sshll.u32 %s1825_s6, 4  ;;  %s1482_s8 = sshll.u32 %s2137_s5, 4  ;;  %s1481_s1 = int_to_ptr.vmem [resolvable:$true] %s1480_s1  ;;  %s1483_s8 = int_to_ptr.hbm [resolvable:$true] %s1482_s8 }
  0x1f   :  { %203 = vrot.lane.b32.xlu0 %v101_v5, %s1810_s4 }
  0x20   :  { %265 = vrot.lane.b32.xlu2 %v97_v0, %s1811_s16 }
  0x21   :  { %267 = vrot.lane.b32.xlu1 %v101_v5, %s1811_s16 }
  0x27   :  { %295 = vrot.lane.b32.xlu0 %v102_v3, %s1811_s16 }
  0x28   :  { %293 = vrot.lane.b32.xlu2 %v98_v4, %s1811_s16 }
  0x29   :  { %331 = vrot.lane.b32.xlu1 %v101_v5, %s1812_s17 }
  0x2f   :  { %329 = vrot.lane.b32.xlu0 %v97_v0, %s1812_s17 }
  0x30   :  { %459 = vrot.lane.b32.xlu2 %v101_v5, %s1813_s18 }
  0x31   :  { %359 = vrot.lane.b32.xlu1 %v102_v3, %s1812_s17 }
  0x37   :  { %357 = vrot.lane.b32.xlu0 %v98_v4, %s1812_s17 }
  0x38   :  { %395 = vrot.lane.b32.xlu2 %v101_v5, %s1814_s19 }
  0x39   :  { %457 = vrot.lane.b32.xlu1 %v97_v0, %s1813_s18 }
  0x3f   :  { %393 = vrot.lane.b32.xlu0 %v97_v0, %s1814_s19 }
  0x40   :  { %587 = vrot.lane.b32.xlu2 %v101_v5, %s1815_s20 }
  0x41   :  { %487 = vrot.lane.b32.xlu1 %v102_v3, %s1813_s18 }
  0x47   :  { %485 = vrot.lane.b32.xlu0 %v98_v4, %s1813_s18 }
  0x48   :  { %423 = vrot.lane.b32.xlu2 %v102_v3, %s1814_s19 }
  0x49   :  { %585 = vrot.lane.b32.xlu1 %v97_v0, %s1815_s20 }
  0x4f   :  { %523 = vrot.lane.b32.xlu0 %v101_v5, %s1816_s21 }
  0x50   :  { %521 = vrot.lane.b32.xlu2 %v97_v0, %s1816_s21 }
  0x51   :  { %421 = vrot.lane.b32.xlu1 %v98_v4, %s1814_s19 }
  0x57   :  { %615 = vrot.lane.b32.xlu0 %v102_v3, %s1815_s20 }
  0x58   :  { %551 = vrot.lane.b32.xlu2 %v102_v3, %s1816_s21 }
  0x59   :  { %613 = vrot.lane.b32.xlu1 %v98_v4, %s1815_s20 }
  0x5f   :  { %549 = vrot.lane.b32.xlu0 %v98_v4, %s1816_s21 }
  0x72   :  { %v230_v6 = vpop.permute.xlu2 %229 }
  0x7a   :  { %v266_v7 = vpop.permute.xlu2 %265 }
  0x82   :  { %v294_v8 = vpop.permute.xlu2 %293 }
  0x89   :  { %v202_v9 = vpop.permute.xlu0 %201 }
  0x8a   :  { %v460_v10 = vpop.permute.xlu2 %459 }
  0x8b   :  { %v232_v11 = vpop.permute.xlu1 %231 }
  0x8c   :  { %1503 = vmatpush.xpose.msk.msrb.mxu3 %vm139_vm0, %v232_v11 }
  0x8f   :  { %1504 = vmatmul.msk.f32.vlgmr.msrb.gmra.mxu3 %vm139_vm0, %v230_v6 }
  0x91   :  { %v204_v12 = vpop.permute.xlu0 %203 }
  0x92   :  { %1501 = vmatpush.xpose.msk.msrb.mxu2 %vm139_vm0, %v204_v12  ;;  %v396_v13 = vpop.permute.xlu2 %395 }
  0x93   :  { %v268_v14 = vpop.permute.xlu1 %267  ;;  %1513 = vmatpush.xpose.msk.msra.mxu0 %vm139_vm0, %v396_v13 }
  0x95   :  { %1502 = vmatmul.msk.f32.vlgmr.msrb.gmra.mxu2 %vm139_vm0, %v202_v9 }
  0x96   :  { %1505 = vmatpush.xpose.msk.msra.mxu2 %vm139_vm0, %v268_v14 }
  0x99   :  { %v296_v15 = vpop.permute.xlu0 %295 }
  0x9a   :  { %1507 = vmatpush.xpose.msk.msra.mxu3 %vm139_vm0, %v296_v15  ;;  %v588_v16 = vpop.permute.xlu2 %587 }
  0x9b   :  { %v332_v17 = vpop.permute.xlu1 %331 }
  0x9c   :  { %1509 = vmatpush.xpose.msk.msrb.mxu2 %vm139_vm0, %v332_v17 }
  0x9d   :  { %1506 = vmatmul.msk.f32.vlgmr.msra.gmra.mxu2 %vm139_vm0, %v266_v7  ;;  %1508 = vmatmul.msk.f32.vlgmr.msra.gmra.mxu3 %vm139_vm0, %v294_v8 }
  0x9f   :  { %v1948_v38 = vpop.f32.mrf.mxu3 }
  0xa0   :  { %1517 = vmatpush.xpose.msk.msra.mxu2 %vm139_vm0, %v460_v10  ;;  %v1928_v21 = vpop.f32.mrf.mxu2 }
  0xa1   :  { %v330_v18 = vpop.permute.xlu0 %329  ;;  %v193_v22 = vsel %vm192_vm1, %v1928_v21, -inf }
  0xa2   :  { %v424_v19 = vpop.permute.xlu2 %423  ;;  %194 = vmax.xlane.f32.xlu2 %v193_v22 }
  0xa3   :  { %v360_v20 = vpop.permute.xlu1 %359  ;;  %1515 = vmatpush.xpose.msk.msra.mxu1 %vm139_vm0, %v424_v19 }
  0xa4   :  { %1511 = vmatpush.xpose.msk.msrb.mxu3 %vm139_vm0, %v360_v20 }
  0xa5   :  { %1510 = vmatmul.msk.f32.vlgmr.msrb.gmra.mxu2 %vm139_vm0, %v330_v18 }
  0xa6   :  { %1525 = vmatpush.xpose.msk.msrb.mxu2 %vm139_vm0, %v588_v16 }
  0xa9   :  { %v358_v23 = vpop.permute.xlu0 %357 }
  0xaa   :  { %1512 = vmatmul.msk.f32.vlgmr.msrb.gmra.mxu3 %vm139_vm0, %v358_v23  ;;  %v522_v24 = vpop.permute.xlu2 %521 }
  0xab   :  { %v458_v25 = vpop.permute.xlu1 %457 }
  0xad   :  { %1518 = vmatmul.msk.f32.vlgmr.msra.gmra.mxu2 %vm139_vm0, %v458_v25 }
  0xb1   :  { %v394_v26 = vpop.permute.xlu0 %393 }
  0xb2   :  { %1514 = vmatmul.msk.f32.vlgmr.msra.gmra.mxu0 %vm139_vm0, %v394_v26  ;;  %v552_v27 = vpop.permute.xlu2 %551 }
  0xb3   :  { %v488_v28 = vpop.permute.xlu1 %487  ;;  %1523 = vmatpush.xpose.msk.msrb.mxu1 %vm139_vm0, %v552_v27 }
  0xb4   :  { %1519 = vmatpush.xpose.msk.msra.mxu3 %vm139_vm0, %v488_v28 }
  0xb9   :  { %v486_v29 = vpop.permute.xlu0 %485 }
  0xba   :  { %1520 = vmatmul.msk.f32.vlgmr.msra.gmra.mxu3 %vm139_vm0, %v486_v29  ;;  %v196_v29 = vsel %vm192_vm1, %v1948_v38, -inf }
  0xbb   :  { %v586_v30 = vpop.permute.xlu1 %585 }
  0xbc   :  { %1526 = vmatmul.msk.f32.vlgmr.msrb.gmra.mxu2 %vm139_vm0, %v586_v30 }
  0xc1   :  { %v524_v31 = vpop.permute.xlu0 %523 }
  0xc2   :  { %1521 = vmatpush.xpose.msk.msrb.mxu0 %vm139_vm0, %v524_v31 }
  0xc3   :  { %v422_v32 = vpop.permute.xlu1 %421 }
  0xc4   :  { %1516 = vmatmul.msk.f32.vlgmr.msra.gmra.mxu1 %vm139_vm0, %v422_v32  ;;  %v103_v32 = vld [vmem:[#allocation7] sm:$0xff] }
  0xc5   :  { %1522 = vmatmul.msk.f32.vlgmr.msrb.gmra.mxu0 %vm139_vm0, %v522_v24 }
  0xc6   :  { %754 = vmatpush.msra.mxu0 %v103_v32 }
  0xc9   :  { %v616_v33 = vpop.permute.xlu0 %615 }
  0xca   :  { %1527 = vmatpush.xpose.msk.msrb.mxu3 %vm139_vm0, %v616_v33  ;;  %v104_v33 = vld [vmem:[#allocation7 + $0x8] sm:$0xff] }
  0xcb   :  { %v614_v34 = vpop.permute.xlu1 %613  ;;  %777 = vmatpush.msra.mxu1 %v104_v33 }
  0xcd   :  { %1528 = vmatmul.msk.f32.vlgmr.msrb.gmra.mxu3 %vm139_vm0, %v614_v34  ;;  %v1979_v34 = vpack.i.bf16 %v104_v33, %v103_v32 }
  0xd1   :  { %v550_v35 = vpop.permute.xlu0 %549 }
  0xd2   :  { %1524 = vmatmul.msk.f32.vlgmr.msrb.gmra.mxu1 %vm139_vm0, %v550_v35 }
 0x112   :  { %v254_v40 = vpop.f32.mrf.mxu3 }
 0x113   :  { %v260_v53 = vsel %vm192_vm1, %v254_v40, -inf }
 0x115   :  { %v1966_v1 = vpop.xlane.xlu2 %194 }
 0x118   :  { %v226_v39 = vpop.f32.mrf.mxu2 }
 0x119   :  { %v257_v47 = vsel %vm192_vm1, %v226_v39, -inf }
 0x120   :  { %v290_v44 = vpop.f32.mrf.mxu2  ;;  %v318_v46 = vpop.f32.mrf.mxu3 }
 0x121   :  { %v321_v48 = vsel %vm192_vm1, %v290_v44, -inf  ;;  %v324_v54 = vsel %vm192_vm1, %v318_v46, -inf }
 0x128   :  { %v354_v49 = vpop.f32.mrf.mxu2 }
 0x129   :  { %v385_v57 = vsel %vm192_vm1, %v354_v49, -inf }
 0x12d   :  { %v382_v50 = vpop.f32.mrf.mxu3 }
 0x12e   :  { %v388_v61 = vsel %vm192_vm1, %v382_v50, -inf }
 0x12f   :  { %v418_v36 = vpop.f32.mrf.mxu0 }
 0x130   :  { %v449_v37 = vsel %vm192_vm1, %v418_v36, -inf  ;;  %v482_v56 = vpop.f32.mrf.mxu2 }
 0x131   :  { %450 = vmax.xlane.f32.xlu2 %v449_v37  ;;  %v513_v58 = vsel %vm192_vm1, %v482_v56, -inf }
 0x13d   :  { %v510_v55 = vpop.f32.mrf.mxu3 }
 0x13e   :  { %v516_v59 = vsel %vm192_vm1, %v510_v55, -inf }
 0x13f   :  { %v610_v63 = vpop.f32.mrf.mxu2 }
 0x140   :  { %v641_v0 = vsel %vm192_vm1, %v610_v63, -inf }
 0x141   :  { %v446_v41 = vpop.f32.mrf.mxu1 }
 0x142   :  { %v546_v42 = vpop.f32.mrf.mxu0  ;;  %v452_v43 = vsel %vm192_vm1, %v446_v41, -inf }
 0x143   :  { %453 = vmax.xlane.f32.xlu1 %v452_v43  ;;  %v577_v45 = vsel %vm192_vm1, %v546_v42, -inf  ;;  %v199_v43 = vsub.f32 %v1928_v21, %v1966_v1 }
 0x144   :  { %578 = vmax.xlane.f32.xlu2 %v577_v45 }
 0x14b   :  { %258 = vmax.xlane.f32.xlu1 %v257_v47 }
 0x14c   :  { %322 = vmax.xlane.f32.xlu2 %v321_v48 }
 0x14f   :  { %v1954_v51 = vpop.f32.mrf.mxu1 }
 0x150   :  { %v580_v52 = vsel %vm192_vm1, %v1954_v51, -inf  ;;  %v638_v60 = vpop.f32.mrf.mxu3 }
 0x151   :  { %581 = vmax.xlane.f32.xlu0 %v580_v52  ;;  %v644_v62 = vsel %vm192_vm1, %v638_v60, -inf }
 0x153   :  { %261 = vmax.xlane.f32.xlu1 %v260_v53 }
 0x154   :  { %325 = vmax.xlane.f32.xlu2 %v324_v54 }
 0x159   :  { %386 = vmax.xlane.f32.xlu0 %v385_v57 }
 0x15b   :  { %514 = vmax.xlane.f32.xlu1 %v513_v58 }
 0x15c   :  { %517 = vmax.xlane.f32.xlu2 %v516_v59 }
 0x161   :  { %389 = vmax.xlane.f32.xlu0 %v388_v61 }
 0x163   :  { %645 = vmax.xlane.f32.xlu1 %v644_v62 }
 0x169   :  { %642 = vmax.xlane.f32.xlu0 %v641_v0 }
 0x1a4   :  { %v451_v2 = vpop.xlane.xlu2 %450 }
 0x1a5   :  { %v455_v3 = vsub.f32 %v418_v36, %v451_v2 }
 0x1a7   :  { %675 = vrot.lane.b32.xlu0 %v455_v3, %s1816_s21 }
 0x1b6   :  { %v454_v4 = vpop.xlane.xlu1 %453 }
 0x1b7   :  { %v456_v5 = vsub.f32 %v446_v41, %v454_v4  ;;  %v579_v6 = vpop.xlane.xlu2 %578 }
 0x1b8   :  { %v583_v18 = vsub.f32 %v546_v42, %v579_v6 }
 0x1b9   :  { %677 = vrot.lane.b32.xlu1 %v456_v5, %s1816_s21 }
 0x1be   :  { %v259_v7 = vpop.xlane.xlu1 %258 }
 0x1bf   :  { %v263_v8 = vsub.f32 %v226_v39, %v259_v7  ;;  %v323_v9 = vpop.xlane.xlu2 %322 }
 0x1c0   :  { %v327_v10 = vsub.f32 %v290_v44, %v323_v9 }
 0x1c1   :  { %651 = vrot.lane.b32.xlu0 %v263_v8, %s1805_s27 }
 0x1c2   :  { %659 = vrot.lane.b32.xlu1 %v327_v10, %s1815_s20 }
 0x1c4   :  { %v582_v11 = vpop.xlane.xlu0 %581 }
 0x1c5   :  { %v584_v27 = vsub.f32 %v1954_v51, %v582_v11 }
 0x1c6   :  { %v262_v12 = vpop.xlane.xlu1 %261 }
 0x1c7   :  { %v264_v13 = vsub.f32 %v254_v40, %v262_v12  ;;  %v326_v14 = vpop.xlane.xlu2 %325 }
 0x1c8   :  { %v328_v15 = vsub.f32 %v318_v46, %v326_v14 }
 0x1c9   :  { %653 = vrot.lane.b32.xlu2 %v264_v13, %s1805_s27 }
 0x1ca   :  { %661 = vrot.lane.b32.xlu1 %v328_v15, %s1815_s20 }
 0x1cc   :  { %v387_v16 = vpop.xlane.xlu0 %386 }
 0x1cd   :  { %v391_v22 = vsub.f32 %v354_v49, %v387_v16 }
 0x1ce   :  { %v515_v17 = vpop.xlane.xlu1 %514 }
 0x1cf   :  { %v519_v19 = vsub.f32 %v482_v56, %v515_v17  ;;  %v518_v26 = vpop.xlane.xlu2 %517 }
 0x1d0   :  { %v520_v28 = vsub.f32 %v510_v55, %v518_v26 }
 0x1d1   :  { %691 = vrot.lane.b32.xlu2 %v583_v18, %s1813_s18 }
 0x1d2   :  { %683 = vrot.lane.b32.xlu1 %v519_v19, %s1817_s22 }
 0x1d4   :  { %v390_v20 = vpop.xlane.xlu0 %389 }
 0x1d5   :  { %v392_v25 = vsub.f32 %v382_v50, %v390_v20 }
 0x1d6   :  { %v646_v30 = vpop.xlane.xlu1 %645 }
 0x1d7   :  { %v648_v31 = vsub.f32 %v638_v60, %v646_v30 }
 0x1d9   :  { %667 = vrot.lane.b32.xlu2 %v391_v22, %s1818_s23 }
 0x1dc   :  { %v643_v23 = vpop.xlane.xlu0 %642 }
 0x1dd   :  { %v647_v24 = vsub.f32 %v610_v63, %v643_v23 }
 0x1df   :  { %699 = vrot.lane.b32.xlu1 %v647_v24, %s1819_s24 }
 0x1e1   :  { %669 = vrot.lane.b32.xlu2 %v392_v25, %s1818_s23 }
 0x1e7   :  { %693 = vrot.lane.b32.xlu1 %v584_v27, %s1813_s18 }
 0x1e9   :  { %685 = vrot.lane.b32.xlu2 %v520_v28, %s1817_s22 }
 0x1eb   :  { %197 = vmax.xlane.f32.xlu0 %v196_v29 }
 0x1ef   :  { %1569 = vrot.lane.b32.xlu1 %v1979_v34, %s1810_s4 }
 0x1f1   :  { %701 = vrot.lane.b32.xlu2 %v648_v31, %s1819_s24 }
 0x1f7   :  { %1579 = vrot.lane.b32.xlu1 %v1979_v34, %s1811_s16 }
 0x1f9   :  { %1574 = vrot.lane.b32.xlu2 %v1979_v34, %s1812_s17 }
 0x1ff   :  { %1584 = vrot.lane.b32.xlu1 %v1979_v34, %s1813_s18 }
 0x207   :  { %1589 = vrot.lane.b32.xlu1 %v1979_v34, %s1814_s19 }
 0x219   :  { %v676_v39 = vpop.permute.xlu0 %675 }
 0x223   :  { %v654_v36 = vpop.permute.xlu2 %653 }
 0x22b   :  { %v678_v35 = vpop.permute.xlu1 %677  ;;  %v692_v40 = vpop.permute.xlu2 %691 }
 0x233   :  { %v652_v42 = vpop.permute.xlu0 %651  ;;  %v668_v46 = vpop.permute.xlu2 %667 }
 0x234   :  { %v660_v37 = vpop.permute.xlu1 %659  ;;  %v705_v44 = vsel %vm192_vm1, %v199_v43, %v652_v42 }
 0x235   :  { %v707_v45 = vsel %vm139_vm0, %v705_v44, %v660_v37 }
 0x236   :  { %v710_v48 = vsel %vm709_vm2, %v707_v45, %v668_v46 }
 0x237   :  { %v713_v49 = vsel %vm712_vm3, %v710_v48, %v676_v39 }
 0x23b   :  { %v670_v52 = vpop.permute.xlu2 %669 }
 0x23c   :  { %v662_v41 = vpop.permute.xlu1 %661 }
 0x243   :  { %v686_v56 = vpop.permute.xlu2 %685 }
 0x244   :  { %v684_v47 = vpop.permute.xlu1 %683 }
 0x245   :  { %v716_v50 = vsel %vm715_vm4, %v713_v49, %v684_v47 }
 0x246   :  { %v719_v21 = vsel %vm718_vm5, %v716_v50, %v692_v40 }
 0x24b   :  { %v702_v1 = vpop.permute.xlu2 %701 }
 0x251   :  { %v700_v51 = vpop.permute.xlu1 %699 }
 0x252   :  { %v722_v53 = vsel %vm721_vm6, %v719_v21, %v700_v51 }
 0x253   :  { %v724_v54 = vmul.f32 1.442695, %v722_v53  ;;  %v1575_v5 = vpop.permute.xlu2 %1574 }
 0x254   :  { %v1577_v6 = vunpack.i.h.bf16 %v1575_v5  ;;  %v1576_v7 = vunpack.i.l.bf16 %v1575_v5 }
 0x255   :  { %1603 = vpow2.f32 %v724_v54 }
 0x259   :  { %v694_v63 = vpop.permute.xlu1 %693 }
 0x25b   :  { %v1604_v55 = vpop.eup %1603 }
 0x25c   :  { %912 = vrot.lane.b32.xlu2 %v1604_v55, %s1820_s25  ;;  %782 = vrot.lane.b32.xlu0 %v1604_v55, %s1821_s28  ;;  %v728_v18 = vsel %vm192_vm1, %v1604_v55, 0.0 }
 0x25d   :  { %1529 = vmatmul.msk.f32.vlgmr.msra.gmra.mxu0 %vm192_vm1, %v1604_v55 }
 0x25e   :  { %v198_v57 = vpop.xlane.xlu0 %197 }
 0x25f   :  { %v200_v58 = vsub.f32 %v1948_v38, %v198_v57 }
 0x261   :  { %v706_v59 = vsel %vm192_vm1, %v200_v58, %v654_v36  ;;  %v1570_v8 = vpop.permute.xlu1 %1569 }
 0x262   :  { %v708_v60 = vsel %vm139_vm0, %v706_v59, %v662_v41  ;;  %v1572_v9 = vunpack.i.h.bf16 %v1570_v8  ;;  %v1571_v10 = vunpack.i.l.bf16 %v1570_v8 }
 0x263   :  { %v711_v61 = vsel %vm709_vm2, %v708_v60, %v670_v52 }
 0x264   :  { %v714_v62 = vsel %vm712_vm3, %v711_v61, %v678_v35  ;;  %848 = vrot.lane.b32.xlu2 %v1604_v55, %s1810_s4  ;;  %817 = vmatpush.msra.mxu2 %v1571_v10 }
 0x265   :  { %v717_v0 = vsel %vm715_vm4, %v714_v62, %v686_v56  ;;  %843 = vmatpush.msra.mxu3 %v1572_v9 }
 0x266   :  { %v720_v2 = vsel %vm718_vm5, %v717_v0, %v694_v63  ;;  %946 = vmatpush.msrb.mxu2 %v1576_v7 }
 0x267   :  { %v723_v3 = vsel %vm721_vm6, %v720_v2, %v702_v1  ;;  %971 = vmatpush.msrb.mxu3 %v1577_v6 }
 0x268   :  { %v726_v4 = vmul.f32 1.442695, %v723_v3 }
 0x269   :  { %v1580_v11 = vpop.permute.xlu1 %1579 }
 0x26a   :  { %1605 = vpow2.f32 %v726_v4  ;;  %v1582_v12 = vunpack.i.h.bf16 %v1580_v11  ;;  %v1581_v13 = vunpack.i.l.bf16 %v1580_v11 }
 0x26c   :  { %1040 = vrot.lane.b32.xlu2 %v1604_v55, %s1822_s29  ;;  %882 = vmatpush.msrb.mxu0 %v1581_v13  ;;  %v120_v13 = vld [vmem:[#allocation8 + $0x78] sm:$0xff] }
 0x26d   :  { %907 = vmatpush.msrb.mxu1 %v1582_v12 }
 0x270   :  { %v1606_v38 = vpop.eup %1605 }
 0x271   :  { %914 = vrot.lane.b32.xlu0 %v1606_v38, %s1820_s25  ;;  %784 = vrot.lane.b32.xlu1 %v1606_v38, %s1821_s28  ;;  %v1585_v14 = vpop.permute.xlu1 %1584  ;;  %v731_v22 = vsel %vm192_vm1, %v1606_v38, 0.0 }
 0x272   :  { %1530 = vmatmul.msk.f32.vlgmr.msra.gmra.mxu1 %vm192_vm1, %v1606_v38  ;;  %v1586_v27 = vunpack.i.l.bf16 %v1585_v14  ;;  %v1587_v36 = vunpack.i.h.bf16 %v1585_v14 }
 0x274   :  { %976 = vrot.lane.b32.xlu2 %v1604_v55, %s1811_s16 }
 0x279   :  { %850 = vrot.lane.b32.xlu0 %v1606_v38, %s1810_s4  ;;  %1594 = vrot.lane.b32.xlu1 %v1979_v34, %s1815_s20  ;;  %v1590_v15 = vpop.permute.xlu1 %1589 }
 0x27a   :  { %v1592_v16 = vunpack.i.h.bf16 %v1590_v15  ;;  %v1591_v17 = vunpack.i.l.bf16 %v1590_v15  ;;  %v119_v15 = vld [vmem:[#allocation8 + $0x70] sm:$0xff] }
 0x27c   :  { %1168 = vrot.lane.b32.xlu2 %v1604_v55, %s1823_s30  ;;  %1010 = vmatpush.msra.mxu0 %v1591_v17  ;;  %v118_v17 = vld [vmem:[#allocation8 + $0x68] sm:$0xff] }
 0x27d   :  { %1035 = vmatpush.msra.mxu1 %v1592_v16 }
 0x281   :  { %1042 = vrot.lane.b32.xlu0 %v1606_v38, %s1822_s29  ;;  %1599 = vrot.lane.b32.xlu1 %v1979_v34, %s1816_s21 }
 0x284   :  { %1104 = vrot.lane.b32.xlu2 %v1604_v55, %s1812_s17 }
 0x289   :  { %978 = vrot.lane.b32.xlu0 %v1606_v38, %s1811_s16  ;;  %1170 = vrot.lane.b32.xlu1 %v1606_v38, %s1823_s30 }
 0x291   :  { %1106 = vrot.lane.b32.xlu0 %v1606_v38, %s1812_s17 }
 0x2ad   :  { %729 = vadd.xlane.f32.xlu2 %v728_v18  ;;  %v117_v18 = vld [vmem:[#allocation8 + $0x60] sm:$0xff] }
 0x2b6   :  { %v913_v19 = vpop.permute.xlu2 %912 }
 0x2b7   :  { %v918_v20 = vsel %vm192_vm1, %v913_v19, 0.0 }
 0x2b8   :  { %919 = vadd.xlane.f32.xlu2 %v918_v20 }
 0x2bb   :  { %732 = vadd.xlane.f32.xlu0 %v731_v22  ;;  %v115_v22 = vld [vmem:[#allocation8 + $0x50] sm:$0xff] }
 0x2be   :  { %v849_v23 = vpop.permute.xlu2 %848 }
 0x2bf   :  { %1533 = vmatmul.msk.f32.vlgmr.msrb.gmra.mxu0 %vm192_vm1, %v849_v23  ;;  %v854_v24 = vsel %vm192_vm1, %v849_v23, 0.0 }
 0x2c3   :  { %855 = vadd.xlane.f32.xlu0 %v854_v24 }
 0x2c6   :  { %v1041_v25 = vpop.permute.xlu2 %1040 }
 0x2c7   :  { %v1046_v26 = vsel %vm192_vm1, %v1041_v25, 0.0 }
 0x2cb   :  { %1047 = vadd.xlane.f32.xlu0 %v1046_v26  ;;  %v113_v26 = vld [vmem:[#allocation8 + $0x40] sm:$0xff] }
 0x2ce   :  { %v783_v28 = vpop.permute.xlu0 %782  ;;  %v977_v29 = vpop.permute.xlu2 %976 }
 0x2cf   :  { %1531 = vmatmul.msk.f32.vlgmr.msra.gmra.mxu2 %vm192_vm1, %v783_v28  ;;  %1537 = vmatmul.msk.f32.vlgmr.msra.gmra.mxu0 %vm192_vm1, %v977_v29  ;;  %v788_v30 = vsel %vm192_vm1, %v783_v28, 0.0  ;;  %v982_v32 = vsel %vm192_vm1, %v977_v29, 0.0  ;;  %v111_v28 = vld [vmem:[#allocation8 + $0x30] sm:$0xff] }
 0x2d0   :  { %789 = vadd.xlane.f32.xlu1 %v788_v30  ;;  %1074 = vmatpush.msra.mxu2 %v1586_v27  ;;  %v112_v27 = vld [vmem:[#allocation8 + $0x38] sm:$0xff] }
 0x2d6   :  { %v1169_v31 = vpop.permute.xlu2 %1168 }
 0x2d7   :  { %1535 = vmatmul.msk.f32.vlgmr.msrb.gmra.mxu2 %vm192_vm1, %v913_v19  ;;  %v1174_v34 = vsel %vm192_vm1, %v1169_v31, 0.0  ;;  %v116_v19 = vld [vmem:[#allocation8 + $0x58] sm:$0xff] }
 0x2d8   :  { %983 = vadd.xlane.f32.xlu1 %v982_v32  ;;  %v109_v32 = vld [vmem:[#allocation8 + $0x20] sm:$0xff] }
 0x2da   :  { %v2050_v57 = vpop.f32.mrf.mxu0 }
 0x2de   :  { %v1105_v33 = vpop.permute.xlu2 %1104 }
 0x2df   :  { %1539 = vmatmul.msk.f32.vlgmr.msra.gmra.mxu2 %vm192_vm1, %v1041_v25  ;;  %v1110_v35 = vsel %vm192_vm1, %v1105_v33, 0.0  ;;  %v114_v25 = vld [vmem:[#allocation8 + $0x48] sm:$0xff] }
 0x2e0   :  { %1175 = vadd.xlane.f32.xlu1 %v1174_v34  ;;  %1111 = vadd.xlane.f32.xlu2 %v1110_v35  ;;  %v108_v34 = vld [vmem:[#allocation8 + $0x18] sm:$0xff]  ;;  %v107_v35 = vld [vmem:[#allocation8 + $0x10] sm:$0xff] }
 0x2e3   :  { %v915_v37 = vpop.permute.xlu0 %914  ;;  %v785_v39 = vpop.permute.xlu1 %784 }
 0x2e4   :  { %1532 = vmatmul.msk.f32.vlgmr.msra.gmra.mxu3 %vm192_vm1, %v785_v39  ;;  %v791_v40 = vsel %vm192_vm1, %v785_v39, 0.0  ;;  %v921_v50 = vsel %vm192_vm1, %v915_v37, 0.0  ;;  %v106_v39 = vld [vmem:[#allocation8 + $0x8] sm:$0xff] }
 0x2e5   :  { %1099 = vmatpush.msra.mxu3 %v1587_v36 }
 0x2e8   :  { %792 = vadd.xlane.f32.xlu2 %v791_v40  ;;  %v105_v40 = vld [vmem:[#allocation8] sm:$0xff] }
 0x2eb   :  { %v851_v41 = vpop.permute.xlu0 %850  ;;  %v1595_v42 = vpop.permute.xlu1 %1594 }
 0x2ec   :  { %v1597_v43 = vunpack.i.h.bf16 %v1595_v42  ;;  %v1596_v44 = vunpack.i.l.bf16 %v1595_v42  ;;  %1534 = vmatmul.msk.f32.vlgmr.msrb.gmra.mxu1 %vm192_vm1, %v851_v41  ;;  %1536 = vmatmul.msk.f32.vlgmr.msrb.gmra.mxu3 %vm192_vm1, %v915_v37  ;;  %v857_v45 = vsel %vm192_vm1, %v851_v41, 0.0 }
 0x2ed   :  { %858 = vadd.xlane.f32.xlu0 %v857_v45 }
 0x2ee   :  { %1202 = vmatpush.msrb.mxu2 %v1596_v44  ;;  %1227 = vmatpush.msrb.mxu3 %v1597_v43 }
 0x2ef   :  { %1543 = vmatmul.msk.f32.vlgmr.msrb.gmra.mxu2 %vm192_vm1, %v1169_v31  ;;  %v2054_v62 = vpop.f32.mrf.mxu1  ;;  %v110_v31 = vld [vmem:[#allocation8 + $0x28] sm:$0xff] }
 0x2f3   :  { %v1043_v46 = vpop.permute.xlu0 %1042  ;;  %v1600_v47 = vpop.permute.xlu1 %1599 }
 0x2f4   :  { %v1602_v48 = vunpack.i.h.bf16 %v1600_v47  ;;  %v1601_v49 = vunpack.i.l.bf16 %v1600_v47  ;;  %1540 = vmatmul.msk.f32.vlgmr.msra.gmra.mxu3 %vm192_vm1, %v1043_v46  ;;  %v1049_v52 = vsel %vm192_vm1, %v1043_v46, 0.0 }
 0x2f5   :  { %922 = vadd.xlane.f32.xlu0 %v921_v50 }
 0x2f6   :  { %1138 = vmatpush.msrb.mxu0 %v1601_v49  ;;  %1163 = vmatpush.msrb.mxu1 %v1602_v48 }
 0x2f7   :  { %1541 = vmatmul.msk.f32.vlgmr.msrb.gmra.mxu0 %vm192_vm1, %v1105_v33 }
 0x2f8   :  { %1322 = vmatpush.msra.mxu0 %v120_v13 }
 0x2fa   :  { %1323 = vmatpush.msra.mxu0 %v119_v15 }
 0x2fb   :  { %v979_v51 = vpop.permute.xlu0 %978  ;;  %v1171_v21 = vpop.permute.xlu1 %1170 }
 0x2fc   :  { %1538 = vmatmul.msk.f32.vlgmr.msra.gmra.mxu1 %vm192_vm1, %v979_v51  ;;  %1544 = vmatmul.msk.f32.vlgmr.msrb.gmra.mxu3 %vm192_vm1, %v1171_v21  ;;  %v985_v53 = vsel %vm192_vm1, %v979_v51, 0.0  ;;  %v1177_v55 = vsel %vm192_vm1, %v1171_v21, 0.0 }
 0x2fd   :  { %1050 = vadd.xlane.f32.xlu0 %v1049_v52  ;;  %986 = vadd.xlane.f32.xlu1 %v985_v53 }
 0x2fe   :  { %1324 = vmatpush.msra.mxu0 %v118_v17 }
 0x300   :  { %1325 = vmatpush.msra.mxu0 %v117_v18 }
 0x302   :  { %1326 = vmatpush.msra.mxu0 %v116_v19 }
 0x303   :  { %v1107_v54 = vpop.permute.xlu0 %1106 }
 0x304   :  { %1542 = vmatmul.msk.f32.vlgmr.msrb.gmra.mxu1 %vm192_vm1, %v1107_v54  ;;  %v1113_v56 = vsel %vm192_vm1, %v1107_v54, 0.0  ;;  %1327 = vmatpush.msra.mxu0 %v115_v22 }
 0x305   :  { %1178 = vadd.xlane.f32.xlu0 %v1177_v55  ;;  %1114 = vadd.xlane.f32.xlu2 %v1113_v56 }
 0x306   :  { %1328 = vmatpush.msra.mxu0 %v114_v25 }
 0x308   :  { %1329 = vmatpush.msra.mxu0 %v113_v26 }
 0x30a   :  { %1330 = vmatpush.msra.mxu0 %v112_v27 }
 0x30c   :  { %1331 = vmatpush.msra.mxu0 %v111_v28 }
 0x30e   :  { %1332 = vmatpush.msra.mxu0 %v110_v31 }
 0x310   :  { %1333 = vmatpush.msra.mxu0 %v109_v32 }
 0x312   :  { %1334 = vmatpush.msra.mxu0 %v108_v34 }
 0x314   :  { %1335 = vmatpush.msra.mxu0 %v107_v35 }
 0x316   :  { %1336 = vmatpush.msra.mxu0 %v106_v39  ;;  %v1649_v39 = vld [vmem:[#allocation2] sm:$0xff] }
 0x318   :  { %1337 = vmatpush.msra.mxu0 %v105_v40 }
 0x320   :  { %v730_v10 = vpop.xlane.xlu2 %729 }
 0x32b   :  { %v920_v14 = vpop.xlane.xlu2 %919 }
 0x32e   :  { %v733_v8 = vpop.xlane.xlu0 %732 }
 0x336   :  { %v856_v9 = vpop.xlane.xlu0 %855 }
 0x33c   :  { %v884_v58 = vpop.f32.mrf.mxu0 }
 0x33d   :  { %1242 = vrot.lane.b32.xlu2 %v884_v58, %s1816_s21 }
 0x33e   :  { %v1048_v11 = vpop.xlane.xlu0 %1047 }
 0x343   :  { %v790_v12 = vpop.xlane.xlu1 %789 }
 0x344   :  { %1607 = vrcp.f32 %v790_v12 }
 0x345   :  { %1609 = vrcp.f32 %v730_v10 }
 0x346   :  { %1611 = vrcp.f32 %v856_v9 }
 0x34a   :  { %v1608_v46 = vpop.eup %1607 }
 0x34b   :  { %v984_v20 = vpop.xlane.xlu1 %983  ;;  %v1610_v48 = vpop.eup %1609 }
 0x34c   :  { %v1012_v59 = vpop.f32.mrf.mxu0  ;;  %1613 = vrcp.f32 %v984_v20  ;;  %v1306_v49 = vsel %vm139_vm0, %v1610_v48, %v1608_v46  ;;  %v1612_v51 = vpop.eup %1611  ;;  %v136_v48 = vld [vmem:[#allocation8 + $0xf0] sm:$0xff] }
 0x34d   :  { %1258 = vrot.lane.b32.xlu2 %v1012_v59, %s1814_s19  ;;  %1615 = vrcp.f32 %v920_v14  ;;  %v1308_v52 = vsel %vm712_vm3, %v1306_v49, %v1612_v51 }
 0x34e   :  { %1617 = vrcp.f32 %v733_v8 }
 0x34f   :  { %1619 = vrcp.f32 %v1048_v11 }
 0x352   :  { %v819_v60 = vpop.f32.mrf.mxu2  ;;  %v1614_v53 = vpop.eup %1613 }
 0x353   :  { %v1112_v23 = vpop.xlane.xlu2 %1111  ;;  %v1176_v29 = vpop.xlane.xlu1 %1175 }
 0x354   :  { %1621 = vrcp.f32 %v1112_v23  ;;  %v1616_v56 = vpop.eup %1615 }
 0x355   :  { %1623 = vrcp.f32 %v1176_v29  ;;  %v1618_v59 = vpop.eup %1617 }
 0x35a   :  { %v948_v61 = vpop.f32.mrf.mxu2 }
 0x35b   :  { %v793_v30 = vpop.xlane.xlu2 %792 }
 0x35c   :  { %1625 = vrcp.f32 %v793_v30 }
 0x360   :  { %v2068_v16 = vpop.xlane.xlu0 %858 }
 0x361   :  { %1627 = vrcp.f32 %v2068_v16 }
 0x362   :  { %v1076_v63 = vpop.f32.mrf.mxu2 }
 0x363   :  { %1266 = vrot.lane.b32.xlu2 %v1076_v63, %s1812_s17 }
 0x367   :  { %v845_v0 = vpop.f32.mrf.mxu3 }
 0x368   :  { %1236 = vrot.lane.b32.xlu0 %v845_v0, %s1815_s20  ;;  %v923_v24 = vpop.xlane.xlu0 %922 }
 0x369   :  { %v909_v1 = vpop.f32.mrf.mxu1  ;;  %1629 = vrcp.f32 %v923_v24 }
 0x36a   :  { %1244 = vrot.lane.b32.xlu1 %v909_v1, %s1816_s21 }
 0x36f   :  { %v973_v2 = vpop.f32.mrf.mxu3 }
 0x370   :  { %1250 = vrot.lane.b32.xlu0 %v948_v61, %s1813_s18  ;;  %v1051_v33 = vpop.xlane.xlu0 %1050  ;;  %v987_v36 = vpop.xlane.xlu1 %986 }
 0x371   :  { %v1620_v61 = vpop.eup %1619  ;;  %1631 = vrcp.f32 %v987_v36 }
 0x372   :  { %1234 = vrot.lane.b32.xlu1 %v819_v60, %s1815_s20  ;;  %v1204_v3 = vpop.f32.mrf.mxu2  ;;  %v1310_v60 = vsel %vm718_vm5, %v1308_v52, %v1616_v56  ;;  %v1622_v0 = vpop.eup %1621  ;;  %1633 = vrcp.f32 %v1051_v33 }
 0x373   :  { %1282 = vrot.lane.b32.xlu2 %v1204_v3, %s1810_s4  ;;  %v1312_v63 = vsel %vm1294_vm7, %v1310_v60, %v1614_v53  ;;  %v1624_v1 = vpop.eup %1623  ;;  %v135_v60 = vld [vmem:[#allocation8 + $0xe8] sm:$0xff] }
 0x374   :  { %v1140_v5 = vpop.f32.mrf.mxu0  ;;  %v1626_v3 = vpop.eup %1625 }
 0x375   :  { %v1307_v14 = vsel %vm139_vm0, %v1618_v59, %v1626_v3  ;;  %v129_v3 = vld [vmem:[#allocation8 + $0xb8] sm:$0xff] }
 0x377   :  { %v1101_v4 = vpop.f32.mrf.mxu3 }
 0x378   :  { %v1115_v37 = vpop.xlane.xlu2 %1114  ;;  %v1179_v41 = vpop.xlane.xlu0 %1178 }
 0x379   :  { %v1037_v38 = vpop.f32.mrf.mxu1  ;;  %1635 = vrcp.f32 %v1115_v37 }
 0x37a   :  { %1252 = vrot.lane.b32.xlu1 %v973_v2, %s1813_s18  ;;  %1260 = vrot.lane.b32.xlu0 %v1037_v38, %s1814_s19  ;;  %v1628_v38 = vpop.eup %1627  ;;  %1637 = vrcp.f32 %v1179_v41 }
 0x37b   :  { %v1309_v17 = vsel %vm712_vm3, %v1307_v14, %v1628_v38  ;;  %v127_v38 = vld [vmem:[#allocation8 + $0xa8] sm:$0xff] }
 0x37f   :  { %v1229_v6 = vpop.f32.mrf.mxu3 }
 0x381   :  { %v1165_v7 = vpop.f32.mrf.mxu1 }
 0x382   :  { %1274 = vrot.lane.b32.xlu1 %v1140_v5, %s1811_s16  ;;  %1284 = vrot.lane.b32.xlu0 %v1229_v6, %s1810_s4  ;;  %v1630_v6 = vpop.eup %1629 }
 0x383   :  { %1276 = vrot.lane.b32.xlu2 %v1165_v7, %s1811_s16  ;;  %v1632_v10 = vpop.eup %1631  ;;  %v1311_v19 = vsel %vm718_vm5, %v1309_v17, %v1630_v6  ;;  %v125_v6 = vld [vmem:[#allocation8 + $0x98] sm:$0xff] }
 0x384   :  { %v1634_v20 = vpop.eup %1633 }
 0x385   :  { %v1636_v23 = vpop.eup %1635 }
 0x386   :  { %v1638_v26 = vpop.eup %1637 }
 0x38a   :  { %1268 = vrot.lane.b32.xlu1 %v1101_v4, %s1812_s17  ;;  %v1314_v4 = vsel %vm1297_vm8, %v1312_v63, %v1620_v61  ;;  %v134_v61 = vld [vmem:[#allocation8 + $0xe0] sm:$0xff]  ;;  %v133_v63 = vld [vmem:[#allocation8 + $0xd8] sm:$0xff] }
 0x38b   :  { %v1316_v5 = vsel %vm1300_vm9, %v1314_v4, %v1622_v0  ;;  %v132_v0 = vld [vmem:[#allocation8 + $0xd0] sm:$0xff] }
 0x38c   :  { %v1318_v15 = vsel %vm1303_vm10, %v1316_v5, %v1624_v1  ;;  %v131_v1 = vld [vmem:[#allocation8 + $0xc8] sm:$0xff]  ;;  %v128_v4 = vld [vmem:[#allocation8 + $0xb0] sm:$0xff]  ;;  %v126_v5 = vld [vmem:[#allocation8 + $0xa0] sm:$0xff] }
 0x397   :  { %v1243_v43 = vpop.permute.xlu2 %1242 }
 0x3a7   :  { %v1259_v47 = vpop.permute.xlu2 %1258 }
 0x3bd   :  { %v1267_v58 = vpop.permute.xlu2 %1266 }
 0x3cd   :  { %v1283_v11 = vpop.permute.xlu2 %1282 }
 0x3da   :  { %v1237_v44 = vpop.permute.xlu0 %1236 }
 0x3db   :  { %v1289_v12 = vsel %vm139_vm0, %v2054_v62, %v1237_v44  ;;  %v1313_v62 = vsel %vm1294_vm7, %v1311_v19, %v1632_v10  ;;  %v1824_v44 = vmov 128.0  }
 0x3dc   :  { %v2070_v42 = vpop.permute.xlu1 %1244  ;;  %v1315_v25 = vsel %vm1297_vm8, %v1313_v62, %v1634_v20  ;;  %1639 = vrcp.f32 %v1824_v44 }
 0x3dd   :  { %v1291_v22 = vsel %vm712_vm3, %v1289_v12, %v2070_v42  ;;  %v1317_v29 = vsel %vm1300_vm9, %v1315_v25, %v1636_v23  ;;  %v1277_v30 = vpop.permute.xlu2 %1276  ;;  %v1650_v42 = vld [vmem:[#allocation2 + $0x8] sm:$0xff] }
 0x3de   :  { %v1319_v35 = vsel %vm1303_vm10, %v1317_v29, %v1638_v26 }
 0x3e2   :  { %v1251_v54 = vpop.permute.xlu0 %1250 }
 0x3e4   :  { %v1235_v45 = vpop.permute.xlu1 %1234 }
 0x3e5   :  { %v1288_v50 = vsel %vm139_vm0, %v2050_v57, %v1235_v45  ;;  %v1640_v45 = vpop.eup %1639 }
 0x3e6   :  { %v1290_v21 = vsel %vm712_vm3, %v1288_v50, %v1243_v43  ;;  %v1352_v46 = vmul.f32 128.0, %v1640_v45  ;;  %vm1356_vm11 = vweird.f32 %v1640_v45 }
 0x3e7   :  { %v1292_v57 = vsel %vm718_vm5, %v1290_v21, %v1251_v54 }
 0x3e8   :  { %v1295_v2 = vsel %vm1294_vm7, %v1292_v57, %v1259_v47  ;;  %v137_v47 = vld [vmem:[#allocation8 + $0xf8] sm:$0xff]  ;;  %v1353_v49 = vsub.f32 1.0, %v1352_v46 }
 0x3e9   :  { %v1298_v9 = vsel %vm1297_vm8, %v1295_v2, %v1267_v58  ;;  %1401 = vmatpush.msra.mxu1 %v137_v47  ;;  %v130_v2 = vld [vmem:[#allocation8 + $0xc0] sm:$0xff] }
 0x3ea   :  { %v1354_v50 = vmul.f32 %v1640_v45, %v1353_v49 }
 0x3eb   :  { %1402 = vmatpush.msra.mxu1 %v136_v48 }
 0x3ec   :  { %v1253_v55 = vpop.permute.xlu1 %1252  ;;  %v1261_v7 = vpop.permute.xlu0 %1260  ;;  %v1355_v51 = vadd.f32 %v1640_v45, %v1354_v50 }
 0x3ed   :  { %v1293_v24 = vsel %vm718_vm5, %v1291_v22, %v1253_v55  ;;  %1403 = vmatpush.msra.mxu1 %v135_v60  ;;  %v2114_v22 = vld [vmem:[#allocation10] sm:$0xff] }
 0x3ee   :  { %v1296_v27 = vsel %vm1294_vm7, %v1293_v24, %v1261_v7  ;;  %v2104_v21 = vsel %vm1356_vm11, %v1640_v45, %v1355_v51  ;;  %v124_v7 = vld [vmem:[#allocation8 + $0x90] sm:$0xff]  ;;  %v1394_v25 = vperm.slane %v2114_v22, 1  ;;  %v1397_v29 = vperm.slane %v2114_v22, 2 }
 0x3ef   :  { %1404 = vmatpush.msra.mxu1 %v134_v61 }
 0x3f1   :  { %1405 = vmatpush.msra.mxu1 %v133_v63 }
 0x3f3   :  { %1406 = vmatpush.msra.mxu1 %v132_v0 }
 0x3f4   :  { %v1275_v8 = vpop.permute.xlu1 %1274  ;;  %v1285_v32 = vpop.permute.xlu0 %1284 }
 0x3f5   :  { %v1301_v13 = vsel %vm1300_vm9, %v1298_v9, %v1275_v8  ;;  %1407 = vmatpush.msra.mxu1 %v131_v1  ;;  %v123_v8 = vld [vmem:[#allocation8 + $0x88] sm:$0xff]  ;;  %v122_v9 = vld [vmem:[#allocation8 + $0x80] sm:$0xff] }
 0x3f6   :  { %v1304_v16 = vsel %vm1303_vm10, %v1301_v13, %v1283_v11 }
 0x3f7   :  { %v1320_v18 = vmul.f32 %v1318_v15, %v1304_v16  ;;  %1408 = vmatpush.msra.mxu1 %v130_v2 }
 0x3f9   :  { %1338 = vmatmul.f32.vlgmr.msra.gmra.mxu0 %v1320_v18  ;;  %1409 = vmatpush.msra.mxu1 %v129_v3 }
 0x3fb   :  { %1410 = vmatpush.msra.mxu1 %v128_v4 }
 0x3fc   :  { %v1269_v28 = vpop.permute.xlu1 %1268 }
 0x3fd   :  { %v1299_v31 = vsel %vm1297_vm8, %v1296_v27, %v1269_v28  ;;  %1411 = vmatpush.msra.mxu1 %v127_v38 }
 0x3fe   :  { %v1302_v33 = vsel %vm1300_vm9, %v1299_v31, %v1277_v30 }
 0x3ff   :  { %v1305_v34 = vsel %vm1303_vm10, %v1302_v33, %v1285_v32  ;;  %1412 = vmatpush.msra.mxu1 %v126_v5 }
 0x400   :  { %v1321_v36 = vmul.f32 %v1319_v35, %v1305_v34 }
 0x401   :  { %1413 = vmatpush.msra.mxu1 %v125_v6 }
 0x402   :  { %1341 = vmatmul.f32.gmra.mxu0 %v1321_v36 }
 0x403   :  { %1414 = vmatpush.msra.mxu1 %v124_v7  ;;  %v1468_v7 = vperm.slane %v2114_v22, 3 }
 0x405   :  { %1415 = vmatpush.msra.mxu1 %v123_v8 }
 0x407   :  { %1416 = vmatpush.msra.mxu1 %v122_v9 }
 0x476   :  { %v1339_v37 = vpop.f32.mrf.mxu0 }
 0x477   :  { %v1345_v40 = vadd.f32 %v1649_v39, %v1339_v37 }
 0x479   :  { %1347 = vadd.xlane.f32.xlu1 %v1345_v40 }
 0x47f   :  { %v1342_v41 = vpop.f32.mrf.mxu0 }
 0x480   :  { %v1346_v43 = vadd.f32 %v1650_v42, %v1342_v41 }
 0x482   :  { %1349 = vadd.xlane.f32.xlu2 %v1346_v43 }
 0x4ec   :  { %v1348_v52 = vpop.xlane.xlu1 %1347 }
 0x4ed   :  { %v1358_v53 = vmul.f32 %v2104_v21, %v1348_v52 }
 0x4ef   :  { %v1360_v54 = vsub.f32 %v1345_v40, %v1358_v53  ;;  %v1400_v40 = vperm.slane %v2114_v22, 0 }
 0x4f1   :  { %v1362_v55 = vmul.f32 %v1360_v54, %v1360_v54 }
 0x4f3   :  { %1364 = vadd.xlane.f32.xlu0 %v1362_v55 }
 0x4f5   :  { %v1350_v56 = vpop.xlane.xlu2 %1349 }
 0x4f6   :  { %v1359_v58 = vmul.f32 %v2104_v21, %v1350_v56 }
 0x4f8   :  { %v2108_v59 = vsub.f32 %v1346_v43, %v1359_v58 }
 0x4fa   :  { %v1363_v57 = vmul.f32 %v2108_v59, %v2108_v59 }
 0x4fc   :  { %1366 = vadd.xlane.f32.xlu1 %v1363_v57 }
 0x566   :  { %v1365_v10 = vpop.xlane.xlu0 %1364 }
 0x567   :  { %v1368_v11 = vmul.f32 %v1365_v10, %v2104_v21 }
 0x569   :  { %v1370_v12 = vadd.f32 1e-05, %v1368_v11 }
 0x56b   :  { %1641 = vrsqrt.f32 %v1370_v12  ;;  %vm1378_vm13 = vweird.f32 %v1370_v12 }
 0x56f   :  { %v1367_v13 = vpop.xlane.xlu1 %1366 }
 0x570   :  { %v1369_v14 = vmul.f32 %v1367_v13, %v2104_v21 }
 0x571   :  { %v1642_v15 = vpop.eup %1641 }
 0x572   :  { %v1373_v16 = vmul.f32 %v1642_v15, %v1370_v12  ;;  %v1371_v17 = vadd.f32 1e-05, %v1369_v14  ;;  %vm1379_vm12 = vweird.f32 %v1642_v15 }
 0x573   :  { %vm1380_vm14 = vmor %vm1378_vm13, %vm1379_vm12 }
 0x574   :  { %v1374_v18 = vmul.f32 %v1642_v15, %v1373_v16  ;;  %1643 = vrsqrt.f32 %v1371_v17  ;;  %vm1388_vm0 = vweird.f32 %v1371_v17 }
 0x576   :  { %v1375_v19 = vmul.f32 0.5, %v1374_v18 }
 0x578   :  { %v1376_v20 = vsub.f32 1.5, %v1375_v19 }
 0x57a   :  { %v1644_v62 = vpop.eup %1643  ;;  %v1377_v23 = vmul.f32 %v1642_v15, %v1376_v20 }
 0x57b   :  { %v1383_v24 = vmul.f32 %v1644_v62, %v1371_v17  ;;  %vm1389_vm15 = vweird.f32 %v1644_v62 }
 0x57c   :  { %v1381_v26 = vsel %vm1380_vm14, %v1642_v15, %v1377_v23  ;;  %vm1390_vm1 = vmor %vm1388_vm0, %vm1389_vm15 }
 0x57d   :  { %v1392_v27 = vmul.f32 %v1381_v26, %v1360_v54  ;;  %v1384_v28 = vmul.f32 %v1644_v62, %v1383_v24 }
 0x57f   :  { %v1385_v30 = vmul.f32 0.5, %v1384_v28  ;;  %v1395_v31 = vmul.f32 %v1394_v25, %v1392_v27 }
 0x581   :  { %v1386_v32 = vsub.f32 1.5, %v1385_v30  ;;  %v1398_v33 = vadd.f32 %v1397_v29, %v1395_v31 }
 0x583   :  { %v1387_v34 = vmul.f32 %v1644_v62, %v1386_v32  ;;  %1417 = vmatmul.f32.vlgmr.msra.gmra.mxu1 %v1398_v33 }
 0x585   :  { %v1391_v35 = vsel %vm1390_vm1, %v1644_v62, %v1387_v34 }
 0x586   :  { %v1393_v36 = vmul.f32 %v1391_v35, %v2108_v59 }
 0x588   :  { %v1396_v37 = vmul.f32 %v1394_v25, %v1393_v36 }
 0x58a   :  { %v1399_v39 = vadd.f32 %v1397_v29, %v1396_v37 }
 0x58c   :  { %1420 = vmatmul.f32.gmra.mxu1 %v1399_v39 }
 0x600   :  { %v1418_v41 = vpop.f32.mrf.mxu1 }
 0x601   :  { %v1419_v42 = vadd.f32 %v1418_v41, %v1400_v40 }
 0x603   :  { %v1424_v43 = vmax.f32 %v1419_v42, 0.0 }
 0x605   :  { %v1426_v44 = vadd.f32 %v1424_v43, %v1398_v33 }
 0x607   :  { %1428 = vadd.xlane.f32.xlu2 %v1426_v44 }
 0x609   :  { %v1421_v45 = vpop.f32.mrf.mxu1 }
 0x60a   :  { %v1422_v46 = vadd.f32 %v1421_v45, %v1400_v40 }
 0x60c   :  { %v1425_v47 = vmax.f32 %v1422_v46, 0.0 }
 0x60e   :  { %v1427_v48 = vadd.f32 %v1425_v47, %v1399_v39 }
 0x610   :  { %1430 = vadd.xlane.f32.xlu0 %v1427_v48 }
 0x67a   :  { %v1429_v49 = vpop.xlane.xlu2 %1428 }
 0x67b   :  { %v1432_v50 = vmul.f32 %v1429_v49, %v2104_v21 }
 0x67d   :  { %v1434_v51 = vsub.f32 %v1426_v44, %v1432_v50 }
 0x67f   :  { %v1436_v52 = vmul.f32 %v1434_v51, %v1434_v51 }
 0x681   :  { %1438 = vadd.xlane.f32.xlu1 %v1436_v52 }
 0x683   :  { %v1431_v53 = vpop.xlane.xlu0 %1430 }
 0x684   :  { %v1433_v54 = vmul.f32 %v1431_v53, %v2104_v21 }
 0x686   :  { %v1435_v55 = vsub.f32 %v1427_v48, %v1433_v54 }
 0x688   :  { %v1437_v56 = vmul.f32 %v1435_v55, %v1435_v55 }
 0x68a   :  { %1440 = vadd.xlane.f32.xlu2 %v1437_v56 }
 0x6f4   :  { %v1439_v58 = vpop.xlane.xlu1 %1438 }
 0x6f5   :  { %v1442_v59 = vmul.f32 %v1439_v58, %v2104_v21 }
 0x6f7   :  { %v1444_v57 = vadd.f32 1e-05, %v1442_v59 }
 0x6f9   :  { %1645 = vrsqrt.f32 %v1444_v57  ;;  %vm1452_vm3 = vweird.f32 %v1444_v57 }
 0x6fd   :  { %v1441_v60 = vpop.xlane.xlu2 %1440 }
 0x6fe   :  { %v1443_v61 = vmul.f32 %v1441_v60, %v2104_v21  ;;  %v1471_v21 = vperm.slane %v2114_v22, 4 }
 0x6ff   :  { %v1646_v63 = vpop.eup %1645 }
 0x700   :  { %v1447_v0 = vmul.f32 %v1646_v63, %v1444_v57  ;;  %v1445_v1 = vadd.f32 1e-05, %v1443_v61  ;;  %vm1453_vm2 = vweird.f32 %v1646_v63 }
 0x701   :  { %vm1454_vm4 = vmor %vm1452_vm3, %vm1453_vm2 }
 0x702   :  { %v1448_v2 = vmul.f32 %v1646_v63, %v1447_v0  ;;  %1647 = vrsqrt.f32 %v1445_v1  ;;  %vm1462_vm6 = vweird.f32 %v1445_v1 }
 0x704   :  { %v1449_v3 = vmul.f32 0.5, %v1448_v2 }
 0x706   :  { %v1450_v4 = vsub.f32 1.5, %v1449_v3 }
 0x708   :  { %v1648_v38 = vpop.eup %1647  ;;  %v1451_v5 = vmul.f32 %v1646_v63, %v1450_v4 }
 0x709   :  { %v1457_v6 = vmul.f32 %v1648_v38, %v1445_v1  ;;  %vm1463_vm5 = vweird.f32 %v1648_v38 }
 0x70a   :  { %v1455_v8 = vsel %vm1454_vm4, %v1646_v63, %v1451_v5  ;;  %vm1464_vm7 = vmor %vm1462_vm6, %vm1463_vm5 }
 0x70b   :  { %v1466_v9 = vmul.f32 %v1455_v8, %v1434_v51  ;;  %v1458_v10 = vmul.f32 %v1648_v38, %v1457_v6 }
 0x70d   :  { %v1459_v11 = vmul.f32 0.5, %v1458_v10  ;;  %v1469_v12 = vmul.f32 %v1468_v7, %v1466_v9 }
 0x70f   :  { %v1460_v13 = vsub.f32 1.5, %v1459_v11  ;;  %v1472_v14 = vadd.f32 %v1471_v21, %v1469_v12 }
 0x711   :  { %v1461_v15 = vmul.f32 %v1648_v38, %v1460_v13  ;;  %1474 = vst [vmem:[#allocation11] sm:$0xff] %v1472_v14 }
 0x713   :  { %v1465_v16 = vsel %vm1464_vm7, %v1648_v38, %v1461_v15 }
 0x714   :  { %v1467_v17 = vmul.f32 %v1465_v16, %v1435_v55 }
 0x716   :  { %v1470_v18 = vmul.f32 %v1468_v7, %v1467_v17 }
 0x718   :  { %v1473_v19 = vadd.f32 %v1471_v21, %v1470_v18 }
 0x71a   :  { %1475 = vst [vmem:[#allocation11 + $0x8] sm:$0xff] %v1473_v19 }
 0x71b   :  { %1488 = dma.vmem_to_hbm [thread:$0]  %s1481_s1, 256, %s1483_s8, [#allocation4], %s1804_s26, %s1804_s26, %s1805_s27  }
 0x71c   :  { %1801 = dma.done.wait [#allocation4], 256  }
 0x71d   :  { %1802 = vsyncadd [#allocation4], 4294967040 }
 0x71e   :  { %1493 = vsyncpa [#allocation3], 1 }
 0x71f   :  { %1494 = vsyncpa [#allocation6], 1 }
 0x720   :  { %1495 = vsyncpa [#allocation9], 1 }
 0x721   :  { %1496 = vsyncpa [#allocation4], 1 }

</bundles_post_ra>
